<compile_context>
chip_gen: v6e
topology: v6e:2x2x1
jax: 0.10.0
libtpu: 0.0.40
codegen_flags: <defaults>
</compile_context>

<pallas_src>
import functools

import jax
import jax.numpy as jnp
import numpy as np
from jax import lax
from jax.experimental import pallas as pl
from jax.experimental.pallas import tpu as pltpu


def _sablock_kernel(x_ref, wqkv_ref, wout_ref, bout_ref, o_ref, concat_ref, *,
                    num_groups, heads_per_group, head_dim, seq_len):
    """One batch element per grid step.

    x_ref      : (1, S_pad, D)        bf16 input tokens (zero-padded rows)
    wqkv_ref   : (NG, D, 3*G*hd)      bf16 fused per-group QKV weights
    wout_ref   : (D, D)               bf16 output-projection weight
    bout_ref   : (1, D)               f32  output-projection bias
    o_ref      : (1, S_pad, D)        output (original input dtype)
    concat_ref : (S_pad, D)           bf16 concat scratch (head-major columns)
    """
    s_pad, _ = concat_ref.shape
    group_width = heads_per_group * head_dim

    x = x_ref[0]                                          # (S_pad, D) bf16

    # Key-padding mask (only emitted if the wrapper actually padded S).
    if seq_len < s_pad:
        key_ids = lax.broadcasted_iota(jnp.int32, (1, s_pad), 1)
        key_mask = jnp.where(key_ids < seq_len, 0.0, -1e30).astype(jnp.float32)
    else:
        key_mask = None

    def group_body(g, carry):
        # Fused Q|K|V projection for this head group: MXU N = 3 * group_width.
        w_g = wqkv_ref[g]                                             # (D, 3*Gw) bf16
        proj = jnp.dot(x, w_g, preferred_element_type=jnp.float32)    # (S_pad, 3*Gw) f32

        head_outs = []
        for h in range(heads_per_group):                              # static, small
            lo = h * head_dim
            hi = lo + head_dim
            qh = proj[:, lo:hi].astype(jnp.bfloat16)                  # scale folded into w_q
            kh = proj[:, group_width + lo:group_width + hi].astype(jnp.bfloat16)
            vh = proj[:, 2 * group_width + lo:2 * group_width + hi].astype(jnp.bfloat16)

            # Scores: contract the LAST dims of q and k (no explicit K.T).
            s = lax.dot_general(qh, kh, (((1,), (1,)), ((), ())),
                                preferred_element_type=jnp.float32)   # (S_pad, S_pad)
            if key_mask is not None:
                s = s + key_mask

            # Numerically-stable softmax with deferred normalisation (f32).
            m = jnp.max(s, axis=-1, keepdims=True)                    # (S_pad, 1)
            e = jnp.exp(s - m)                                        # (S_pad, S_pad)
            denom = jnp.sum(e, axis=-1, keepdims=True)                # (S_pad, 1)

            pv = jnp.dot(e.astype(jnp.bfloat16), vh,
                         preferred_element_type=jnp.float32)          # (S_pad, hd)
            oh = pv * pl.reciprocal(denom, approx=True)               # EUP reciprocal
            head_outs.append(oh.astype(jnp.bfloat16))

        o_group = (jnp.concatenate(head_outs, axis=-1)
                   if len(head_outs) > 1 else head_outs[0])           # (S_pad, Gw) bf16

        # Lane-dense store of the whole group at a STATIC lane offset.  The
        # pl.when switch keeps offsets static while g remains a fori index.
        for j in range(num_groups):
            @pl.when(g == j)
            def _store(j=j, o_group=o_group):
                concat_ref[:, j * group_width:(j + 1) * group_width] = o_group

        return carry

    lax.fori_loop(0, num_groups, group_body, 0)

    # ONE (S, D) @ (D, D) output-projection GEMM (K = hidden), plus bias.
    out = jnp.dot(concat_ref[...], wout_ref[...],
                  preferred_element_type=jnp.float32)                 # (S_pad, D) f32
    o_ref[0] = (out + bout_ref[...]).astype(o_ref.dtype)


def _pick_group_size(num_heads, head_dim, group_lanes):
    """Largest divisor G of num_heads with G*head_dim <= group_lanes, preferring
    128-lane-aligned group widths."""
    best, best_aligned = 1, None
    for g in range(1, num_heads + 1):
        if num_heads % g:
            continue
        if g * head_dim > max(group_lanes, head_dim):
            break
        best = g
        if (g * head_dim) % 128 == 0:
            best_aligned = g
    return best_aligned if best_aligned is not None else best


def sablock_forward(x, w_qkv, w_out, b_out, num_heads, *, group_lanes=256):
    """x: (B, S, D); w_qkv: (D, 3D) in (in, out) layout with columns ordered
    (qkv, head, head_dim) to match the torch rearrange 'b h (qkv l d)';
    w_out: (D, D) in (in, out) layout; b_out: (1, D).

    group_lanes: target lane width of a head-group's fused projection
    (256 for v6e/v7x, 128 for v5e)."""
    B, S, D = x.shape
    assert D % num_heads == 0, "hidden size must be divisible by num_heads"
    hd = D // num_heads
    scale = hd ** (-0.5)
    out_dtype = x.dtype

    G = _pick_group_size(num_heads, hd, group_lanes)
    NG = num_heads // G
    Gw = G * hd                                       # group lane width

    # Pad S to a lane multiple: lane-dense scores / QK^T N-dim / output stores.
    S_pad = ((S + 127) // 128) * 128

    # ---- wrapper-side layout plumbing (one-off XLA ops, outside the kernel) --
    # Fold 1/sqrt(head_dim) into the Q columns, then re-pack the fused QKV
    # weight GROUP-major: w_qkv_g[g] has columns [Q heads of g | K | V].
    w_qkv_scaled = w_qkv.at[:, :D].multiply(scale)
    w_qkv_g = (w_qkv_scaled.reshape(D, 3, NG, G, hd)
               .transpose(2, 0, 1, 3, 4)
               .reshape(NG, D, 3 * Gw)
               .astype(jnp.bfloat16))                 # (NG, D, 3*Gw)
    w_out_b = w_out.astype(jnp.bfloat16)              # (D, D)
    b_out_f = b_out.astype(jnp.float32)               # (1, D)

    x_b = x.astype(jnp.bfloat16)                      # halves x HBM->VMEM traffic
    if S_pad != S:
        x_b = jnp.pad(x_b, ((0, 0), (0, S_pad - S), (0, 0)))

    kernel = functools.partial(_sablock_kernel, num_groups=NG,
                               heads_per_group=G, head_dim=hd, seq_len=S)

    # ---- generation-aware VMEM budget ------------------------------------
    try:
        vmem_cap = int(pltpu.get_tpu_info().vmem_capacity_bytes)
    except Exception:                                  # conservative fallback
        vmem_cap = 64 * 1024 * 1024
    out_isz = np.dtype(out_dtype).itemsize
    resident = (
        2 * NG * D * 3 * Gw * 2      # w_qkv_g, double-buffered bf16
        + 2 * D * D * 2              # w_out, double-buffered bf16
        + 2 * D * 4                  # bias (f32), double-buffered
        + 2 * S_pad * D * 2          # double-buffered x tile (bf16)
        + 2 * S_pad * D * out_isz    # double-buffered output tile
        + S_pad * D * 2              # bf16 concat scratch
        + S_pad * 3 * Gw * 4         # live per-group projection (f32)
        + 4 * S_pad * S_pad * 4      # live score/exp intermediates (f32)
        + S_pad * D * 4              # out-projection result before cast
    )
    vmem_limit = int(min(0.75 * vmem_cap, max(2 * resident, 32 * 1024 * 1024)))

    out_padded = pl.pallas_call(
        kernel,
        out_shape=jax.ShapeDtypeStruct((B, S_pad, D), out_dtype),
        grid=(B,),
        in_specs=[
            pl.BlockSpec((1, S_pad, D), lambda b: (b, 0, 0)),      # x (per batch)
            pl.BlockSpec((NG, D, 3 * Gw), lambda b: (0, 0, 0)),    # w_qkv (shared)
            pl.BlockSpec((D, D), lambda b: (0, 0)),                # w_out (shared)
            pl.BlockSpec((1, D), lambda b: (0, 0)),                # b_out (shared)
        ],
        out_specs=pl.BlockSpec((1, S_pad, D), lambda b: (b, 0, 0)),
        scratch_shapes=[pltpu.VMEM((S_pad, D), jnp.bfloat16)],     # concat scratch
        compiler_params=pltpu.CompilerParams(
            dimension_semantics=("parallel",),
            vmem_limit_bytes=vmem_limit),
    )(x_b, w_qkv_g, w_out_b, b_out_f)

    return out_padded[:, :S, :] if S_pad != S else out_padded


def sablock_reference(x, w_qkv, w_out, b_out, num_heads):
    """Pure-JAX f32 reference mirroring the PyTorch forward."""
    B, S, D = x.shape
    hd = D // num_heads
    qkv = x @ w_qkv                                               # (B, S, 3D)
    q, k, v = jnp.split(qkv, 3, axis=-1)

    def split_heads(t):
        return t.reshape(B, S, num_heads, hd).transpose(0, 2, 1, 3)

    q, k, v = map(split_heads, (q, k, v))                         # (B, H, S, hd)
    s = jnp.einsum("bhqd,bhkd->bhqk", q, k) * (hd ** -0.5)
    p = jax.nn.softmax(s, axis=-1)
    o = jnp.einsum("bhqk,bhkd->bhqd", p, v)                       # (B, H, S, hd)
    o = o.transpose(0, 2, 1, 3).reshape(B, S, D)                  # (B, S, D)
    return o @ w_out + b_out[0]


if __name__ == "__main__":
    B, S, D, H = 2, 16, 64, 4   # batch, seq, hidden_size, num_heads

    key = jax.random.PRNGKey(0)
    kx, kq, ko, kb = jax.random.split(key, 4)
    x = jax.random.normal(kx, (B, S, D), dtype=jnp.float32)
    w_qkv = jax.random.normal(kq, (D, 3 * D), dtype=jnp.float32) * 0.05
    w_out = jax.random.normal(ko, (D, D), dtype=jnp.float32) * 0.05
    b_out = jax.random.normal(kb, (1, D), dtype=jnp.float32) * 0.05

    out = sablock_forward(x, w_qkv, w_out, b_out, H)
    out = jax.block_until_ready(out)

    expected = sablock_reference(x, w_qkv, w_out, b_out, H)
    # bf16 matmul operands (f32 accumulation) + approx reciprocal -> relaxed
    # f32 tolerance.
    np.testing.assert_allclose(np.asarray(out), np.asarray(expected),
                               atol=2e-2, rtol=2e-2)
    print("KERNEL_OK")
</pallas_src>

<mosaic_0001>
module attributes {stable_mosaic.version = 11 : i64} {
  func.func @_sablock_kernel(%arg0: i32, %arg1: memref<1x128x64xbf16, #tpu.memory_space<vmem>>, %arg2: memref<1x64x192xbf16, #tpu.memory_space<vmem>>, %arg3: memref<64x64xbf16, #tpu.memory_space<vmem>>, %arg4: memref<1x64xf32, #tpu.memory_space<vmem>>, %arg5: memref<1x128x64xf32, #tpu.memory_space<vmem>>, %arg6: memref<128x64xbf16, #tpu.memory_space<vmem>>) attributes {dimension_semantics = [#tpu.dimension_semantics<parallel>], iteration_bounds = array<i64: 2>, scalar_prefetch = 0 : i64, scratch_operands = 1 : i64, tpu.core_type = #tpu.core_type<tc>, window_params = [{transform_indices = @transform_0, window_bounds = array<i64: 1, 128, 64>}, {pipeline_mode = #tpu.pipeline_mode<synchronous>, transform_indices = @transform_1, window_bounds = array<i64: 1, 64, 192>}, {pipeline_mode = #tpu.pipeline_mode<synchronous>, transform_indices = @transform_2, window_bounds = array<i64: 64, 64>}, {pipeline_mode = #tpu.pipeline_mode<synchronous>, transform_indices = @transform_3, window_bounds = array<i64: 1, 64>}, {transform_indices = @transform_4, window_bounds = array<i64: 1, 128, 64>}]} {
    %c0 = arith.constant 0 : index
    %c0_0 = arith.constant 0 : index
    %c0_1 = arith.constant 0 : index
    %0 = vector.load %arg1[%c0, %c0_0, %c0_1] : memref<1x128x64xbf16, #tpu.memory_space<vmem>>, vector<1x128x64xbf16>
    %1 = vector.shape_cast %0 : vector<1x128x64xbf16> to vector<128x64xbf16>
    %2 = tpu.iota {dimensions = array<i32: 1>} : vector<1x128xi32>
    %c16_i32 = arith.constant 16 : i32
    %3 = vector.broadcast %c16_i32 : i32 to vector<1x128xi32>
    %4 = arith.cmpi slt, %2, %3 : vector<1x128xi32>
    %cst = arith.constant 0.000000e+00 : f32
    %cst_2 = arith.constant -1.000000e+30 : f32
    %5 = vector.broadcast %cst : f32 to vector<1x128xf32>
    %6 = vector.broadcast %cst_2 : f32 to vector<1x128xf32>
    %7 = arith.select %4, %5, %6 : vector<1x128xi1>, vector<1x128xf32>
    %c0_i32 = arith.constant 0 : i32
    %8 = arith.index_cast %c0_i32 : i32 to index
    %c0_3 = arith.constant 0 : index
    %c0_4 = arith.constant 0 : index
    %9 = vector.load %arg2[%8, %c0_3, %c0_4] : memref<1x64x192xbf16, #tpu.memory_space<vmem>>, vector<1x64x192xbf16>
    %10 = vector.shape_cast %9 : vector<1x64x192xbf16> to vector<64x192xbf16>
    %cst_5 = arith.constant dense<0.000000e+00> : vector<128x192xf32>
    %11 = tpu.matmul %1, %10, %cst_5 {dimension_numbers = #tpu.dot_dimension_numbers<[1], [0], [0], [1], [0, 0, 1, 1], [], []>} : vector<128x64xbf16>, vector<64x192xbf16>, vector<128x192xf32> -> vector<128x192xf32>
    %12 = vector.extract_strided_slice %11 {offsets = [0, 0], sizes = [128, 16], strides = [1, 1]} : vector<128x192xf32> to vector<128x16xf32>
    %13 = arith.truncf %12 : vector<128x16xf32> to vector<128x16xbf16>
    %14 = vector.extract_strided_slice %11 {offsets = [0, 64], sizes = [128, 16], strides = [1, 1]} : vector<128x192xf32> to vector<128x16xf32>
    %15 = arith.truncf %14 : vector<128x16xf32> to vector<128x16xbf16>
    %16 = vector.extract_strided_slice %11 {offsets = [0, 128], sizes = [128, 16], strides = [1, 1]} : vector<128x192xf32> to vector<128x16xf32>
    %17 = arith.truncf %16 : vector<128x16xf32> to vector<128x16xbf16>
    %cst_6 = arith.constant dense<0.000000e+00> : vector<128x128xf32>
    %18 = tpu.matmul %13, %15, %cst_6 {dimension_numbers = #tpu.dot_dimension_numbers<[1], [1], [0], [0], [0, 0, 1, 0], [], []>} : vector<128x16xbf16>, vector<128x16xbf16>, vector<128x128xf32> -> vector<128x128xf32>
    %19 = vector.broadcast %7 : vector<1x128xf32> to vector<128x128xf32>
    %20 = arith.addf %18, %19 : vector<128x128xf32>
    %cst_7 = arith.constant dense<0xFF800000> : vector<128xf32>
    %21 = vector.multi_reduction <maximumf>, %20, %cst_7 [1] : vector<128x128xf32> to vector<128xf32>
    %22 = vector.shape_cast %21 : vector<128xf32> to vector<128x1xf32>
    %23 = vector.broadcast %22 : vector<128x1xf32> to vector<128x128xf32>
    %24 = arith.subf %20, %23 : vector<128x128xf32>
    %25 = math.exp %24 : vector<128x128xf32>
    %cst_8 = arith.constant dense<0.000000e+00> : vector<128xf32>
    %26 = vector.multi_reduction <add>, %25, %cst_8 [1] : vector<128x128xf32> to vector<128xf32>
    %27 = vector.shape_cast %26 : vector<128xf32> to vector<128x1xf32>
    %28 = arith.truncf %25 : vector<128x128xf32> to vector<128x128xbf16>
    %cst_9 = arith.constant dense<0.000000e+00> : vector<128x16xf32>
    %29 = tpu.matmul %28, %17, %cst_9 {dimension_numbers = #tpu.dot_dimension_numbers<[1], [0], [0], [1], [0, 0, 1, 1], [], []>} : vector<128x128xbf16>, vector<128x16xbf16>, vector<128x16xf32> -> vector<128x16xf32>
    %30 = tpu.reciprocal %27 {approx = true} : vector<128x1xf32> -> vector<128x1xf32>
    %31 = vector.broadcast %30 : vector<128x1xf32> to vector<128x16xf32>
    %32 = arith.mulf %29, %31 : vector<128x16xf32>
    %33 = arith.truncf %32 : vector<128x16xf32> to vector<128x16xbf16>
    %34 = vector.extract_strided_slice %11 {offsets = [0, 16], sizes = [128, 16], strides = [1, 1]} : vector<128x192xf32> to vector<128x16xf32>
    %35 = arith.truncf %34 : vector<128x16xf32> to vector<128x16xbf16>
    %36 = vector.extract_strided_slice %11 {offsets = [0, 80], sizes = [128, 16], strides = [1, 1]} : vector<128x192xf32> to vector<128x16xf32>
    %37 = arith.truncf %36 : vector<128x16xf32> to vector<128x16xbf16>
    %38 = vector.extract_strided_slice %11 {offsets = [0, 144], sizes = [128, 16], strides = [1, 1]} : vector<128x192xf32> to vector<128x16xf32>
    %39 = arith.truncf %38 : vector<128x16xf32> to vector<128x16xbf16>
    %cst_10 = arith.constant dense<0.000000e+00> : vector<128x128xf32>
    %40 = tpu.matmul %35, %37, %cst_10 {dimension_numbers = #tpu.dot_dimension_numbers<[1], [1], [0], [0], [0, 0, 1, 0], [], []>} : vector<128x16xbf16>, vector<128x16xbf16>, vector<128x128xf32> -> vector<128x128xf32>
    %41 = vector.broadcast %7 : vector<1x128xf32> to vector<128x128xf32>
    %42 = arith.addf %40, %41 : vector<128x128xf32>
    %cst_11 = arith.constant dense<0xFF800000> : vector<128xf32>
    %43 = vector.multi_reduction <maximumf>, %42, %cst_11 [1] : vector<128x128xf32> to vector<128xf32>
    %44 = vector.shape_cast %43 : vector<128xf32> to vector<128x1xf32>
    %45 = vector.broadcast %44 : vector<128x1xf32> to vector<128x128xf32>
    %46 = arith.subf %42, %45 : vector<128x128xf32>
    %47 = math.exp %46 : vector<128x128xf32>
    %cst_12 = arith.constant dense<0.000000e+00> : vector<128xf32>
    %48 = vector.multi_reduction <add>, %47, %cst_12 [1] : vector<128x128xf32> to vector<128xf32>
    %49 = vector.shape_cast %48 : vector<128xf32> to vector<128x1xf32>
    %50 = arith.truncf %47 : vector<128x128xf32> to vector<128x128xbf16>
    %cst_13 = arith.constant dense<0.000000e+00> : vector<128x16xf32>
    %51 = tpu.matmul %50, %39, %cst_13 {dimension_numbers = #tpu.dot_dimension_numbers<[1], [0], [0], [1], [0, 0, 1, 1], [], []>} : vector<128x128xbf16>, vector<128x16xbf16>, vector<128x16xf32> -> vector<128x16xf32>
    %52 = tpu.reciprocal %49 {approx = true} : vector<128x1xf32> -> vector<128x1xf32>
    %53 = vector.broadcast %52 : vector<128x1xf32> to vector<128x16xf32>
    %54 = arith.mulf %51, %53 : vector<128x16xf32>
    %55 = arith.truncf %54 : vector<128x16xf32> to vector<128x16xbf16>
    %56 = vector.extract_strided_slice %11 {offsets = [0, 32], sizes = [128, 16], strides = [1, 1]} : vector<128x192xf32> to vector<128x16xf32>
    %57 = arith.truncf %56 : vector<128x16xf32> to vector<128x16xbf16>
    %58 = vector.extract_strided_slice %11 {offsets = [0, 96], sizes = [128, 16], strides = [1, 1]} : vector<128x192xf32> to vector<128x16xf32>
    %59 = arith.truncf %58 : vector<128x16xf32> to vector<128x16xbf16>
    %60 = vector.extract_strided_slice %11 {offsets = [0, 160], sizes = [128, 16], strides = [1, 1]} : vector<128x192xf32> to vector<128x16xf32>
    %61 = arith.truncf %60 : vector<128x16xf32> to vector<128x16xbf16>
    %cst_14 = arith.constant dense<0.000000e+00> : vector<128x128xf32>
    %62 = tpu.matmul %57, %59, %cst_14 {dimension_numbers = #tpu.dot_dimension_numbers<[1], [1], [0], [0], [0, 0, 1, 0], [], []>} : vector<128x16xbf16>, vector<128x16xbf16>, vector<128x128xf32> -> vector<128x128xf32>
    %63 = vector.broadcast %7 : vector<1x128xf32> to vector<128x128xf32>
    %64 = arith.addf %62, %63 : vector<128x128xf32>
    %cst_15 = arith.constant dense<0xFF800000> : vector<128xf32>
    %65 = vector.multi_reduction <maximumf>, %64, %cst_15 [1] : vector<128x128xf32> to vector<128xf32>
    %66 = vector.shape_cast %65 : vector<128xf32> to vector<128x1xf32>
    %67 = vector.broadcast %66 : vector<128x1xf32> to vector<128x128xf32>
    %68 = arith.subf %64, %67 : vector<128x128xf32>
    %69 = math.exp %68 : vector<128x128xf32>
    %cst_16 = arith.constant dense<0.000000e+00> : vector<128xf32>
    %70 = vector.multi_reduction <add>, %69, %cst_16 [1] : vector<128x128xf32> to vector<128xf32>
    %71 = vector.shape_cast %70 : vector<128xf32> to vector<128x1xf32>
    %72 = arith.truncf %69 : vector<128x128xf32> to vector<128x128xbf16>
    %cst_17 = arith.constant dense<0.000000e+00> : vector<128x16xf32>
    %73 = tpu.matmul %72, %61, %cst_17 {dimension_numbers = #tpu.dot_dimension_numbers<[1], [0], [0], [1], [0, 0, 1, 1], [], []>} : vector<128x128xbf16>, vector<128x16xbf16>, vector<128x16xf32> -> vector<128x16xf32>
    %74 = tpu.reciprocal %71 {approx = true} : vector<128x1xf32> -> vector<128x1xf32>
    %75 = vector.broadcast %74 : vector<128x1xf32> to vector<128x16xf32>
    %76 = arith.mulf %73, %75 : vector<128x16xf32>
    %77 = arith.truncf %76 : vector<128x16xf32> to vector<128x16xbf16>
    %78 = vector.extract_strided_slice %11 {offsets = [0, 48], sizes = [128, 16], strides = [1, 1]} : vector<128x192xf32> to vector<128x16xf32>
    %79 = arith.truncf %78 : vector<128x16xf32> to vector<128x16xbf16>
    %80 = vector.extract_strided_slice %11 {offsets = [0, 112], sizes = [128, 16], strides = [1, 1]} : vector<128x192xf32> to vector<128x16xf32>
    %81 = arith.truncf %80 : vector<128x16xf32> to vector<128x16xbf16>
    %82 = vector.extract_strided_slice %11 {offsets = [0, 176], sizes = [128, 16], strides = [1, 1]} : vector<128x192xf32> to vector<128x16xf32>
    %83 = arith.truncf %82 : vector<128x16xf32> to vector<128x16xbf16>
    %cst_18 = arith.constant dense<0.000000e+00> : vector<128x128xf32>
    %84 = tpu.matmul %79, %81, %cst_18 {dimension_numbers = #tpu.dot_dimension_numbers<[1], [1], [0], [0], [0, 0, 1, 0], [], []>} : vector<128x16xbf16>, vector<128x16xbf16>, vector<128x128xf32> -> vector<128x128xf32>
    %85 = vector.broadcast %7 : vector<1x128xf32> to vector<128x128xf32>
    %86 = arith.addf %84, %85 : vector<128x128xf32>
    %cst_19 = arith.constant dense<0xFF800000> : vector<128xf32>
    %87 = vector.multi_reduction <maximumf>, %86, %cst_19 [1] : vector<128x128xf32> to vector<128xf32>
    %88 = vector.shape_cast %87 : vector<128xf32> to vector<128x1xf32>
    %89 = vector.broadcast %88 : vector<128x1xf32> to vector<128x128xf32>
    %90 = arith.subf %86, %89 : vector<128x128xf32>
    %91 = math.exp %90 : vector<128x128xf32>
    %cst_20 = arith.constant dense<0.000000e+00> : vector<128xf32>
    %92 = vector.multi_reduction <add>, %91, %cst_20 [1] : vector<128x128xf32> to vector<128xf32>
    %93 = vector.shape_cast %92 : vector<128xf32> to vector<128x1xf32>
    %94 = arith.truncf %91 : vector<128x128xf32> to vector<128x128xbf16>
    %cst_21 = arith.constant dense<0.000000e+00> : vector<128x16xf32>
    %95 = tpu.matmul %94, %83, %cst_21 {dimension_numbers = #tpu.dot_dimension_numbers<[1], [0], [0], [1], [0, 0, 1, 1], [], []>} : vector<128x128xbf16>, vector<128x16xbf16>, vector<128x16xf32> -> vector<128x16xf32>
    %96 = tpu.reciprocal %93 {approx = true} : vector<128x1xf32> -> vector<128x1xf32>
    %97 = vector.broadcast %96 : vector<128x1xf32> to vector<128x16xf32>
    %98 = arith.mulf %95, %97 : vector<128x16xf32>
    %99 = arith.truncf %98 : vector<128x16xf32> to vector<128x16xbf16>
    %100 = tpu.concatenate %33, %55, %77, %99 in 1 : vector<128x16xbf16>, vector<128x16xbf16>, vector<128x16xbf16>, vector<128x16xbf16> -> vector<128x64xbf16>
    %c0_i32_22 = arith.constant 0 : i32
    %101 = arith.cmpi eq, %c0_i32, %c0_i32_22 : i32
    %102 = arith.extui %101 : i1 to i32
    %c0_i32_23 = arith.constant 0 : i32
    %103 = arith.cmpi ne, %102, %c0_i32_23 : i32
    scf.if %103 {
      %c0_34 = arith.constant 0 : index
      %c0_35 = arith.constant 0 : index
      %113 = vector.load %arg6[%c0_34, %c0_35] : memref<128x64xbf16, #tpu.memory_space<vmem>>, vector<128x64xbf16>
      tpu.vector_store %arg6[%c0_34, %c0_35], %100 {strides = array<i32>} : memref<128x64xbf16, #tpu.memory_space<vmem>>, vector<128x64xbf16>,
    } else {
    }
    %c1_i32 = arith.constant 1 : i32
    %c0_24 = arith.constant 0 : index
    %c0_25 = arith.constant 0 : index
    %104 = vector.load %arg6[%c0_24, %c0_25] : memref<128x64xbf16, #tpu.memory_space<vmem>>, vector<128x64xbf16>
    %c0_26 = arith.constant 0 : index
    %c0_27 = arith.constant 0 : index
    %105 = vector.load %arg3[%c0_26, %c0_27] : memref<64x64xbf16, #tpu.memory_space<vmem>>, vector<64x64xbf16>
    %cst_28 = arith.constant dense<0.000000e+00> : vector<128x64xf32>
    %106 = tpu.matmul %104, %105, %cst_28 {dimension_numbers = #tpu.dot_dimension_numbers<[1], [0], [0], [1], [0, 0, 1, 1], [], []>} : vector<128x64xbf16>, vector<64x64xbf16>, vector<128x64xf32> -> vector<128x64xf32>
    %c0_29 = arith.constant 0 : index
    %c0_30 = arith.constant 0 : index
    %107 = vector.load %arg4[%c0_29, %c0_30] : memref<1x64xf32, #tpu.memory_space<vmem>>, vector<1x64xf32>
    %108 = vector.broadcast %107 : vector<1x64xf32> to vector<128x64xf32>
    %109 = arith.addf %106, %108 : vector<128x64xf32>
    %c0_31 = arith.constant 0 : index
    %c0_32 = arith.constant 0 : index
    %c0_33 = arith.constant 0 : index
    %110 = vector.load %arg5[%c0_31, %c0_32, %c0_33] : memref<1x128x64xf32, #tpu.memory_space<vmem>>, vector<1x128x64xf32>
    %111 = vector.shape_cast %110 : vector<1x128x64xf32> to vector<128x64xf32>
    %112 = vector.shape_cast %109 : vector<128x64xf32> to vector<1x128x64xf32>
    tpu.vector_store %arg5[%c0_31, %c0_32, %c0_33], %112 {strides = array<i32>} : memref<1x128x64xf32, #tpu.memory_space<vmem>>, vector<1x128x64xf32>,
    return
  }
  func.func @transform_0(%arg0: i32) -> (i32, i32, i32) {
    %c0_i32 = arith.constant 0 : i32
    %c0_i32_0 = arith.constant 0 : i32
    %c0_i32_1 = arith.constant 0 : i32
    return %arg0, %c0_i32, %c0_i32_0 : i32, i32, i32
  }
  func.func @transform_1(%arg0: i32) -> (i32, i32, i32) {
    %c0_i32 = arith.constant 0 : i32
    %c0_i32_0 = arith.constant 0 : i32
    %c0_i32_1 = arith.constant 0 : i32
    %c0_i32_2 = arith.constant 0 : i32
    return %c0_i32, %c0_i32_0, %c0_i32_1 : i32, i32, i32
  }
  func.func @transform_2(%arg0: i32) -> (i32, i32) {
    %c0_i32 = arith.constant 0 : i32
    %c0_i32_0 = arith.constant 0 : i32
    %c0_i32_1 = arith.constant 0 : i32
    return %c0_i32, %c0_i32_0 : i32, i32
  }
  func.func @transform_3(%arg0: i32) -> (i32, i32) {
    %c0_i32 = arith.constant 0 : i32
    %c0_i32_0 = arith.constant 0 : i32
    %c0_i32_1 = arith.constant 0 : i32
    return %c0_i32, %c0_i32_0 : i32, i32
  }
  func.func @transform_4(%arg0: i32) -> (i32, i32, i32) {
    %c0_i32 = arith.constant 0 : i32
    %c0_i32_0 = arith.constant 0 : i32
    %c0_i32_1 = arith.constant 0 : i32
    return %arg0, %c0_i32, %c0_i32_0 : i32, i32, i32
  }
}

</mosaic_0001>

<bundles_post_ra>
// kernel: tpu_custom_call.1
= control target key start
LH: loop header
LB: loop body
LE: loop exit
PB: predicated region body
PF: predicated region fallthrough
CT: control target
= control target key end

     0   :  { %s3681_s15 = smov 0   ;;  %s4988_s0 = inlined_call_operand.vmem [shape: bf16[2,128,64], index: 0, kind: input, shape index: {}]   ;;  %s4989_s1 = inlined_call_operand.vmem [shape: bf16[1,64,192], index: 1, kind: input, shape index: {}]   ;;  %s4990_s2 = inlined_call_operand.vmem [shape: bf16[64,64], index: 2, kind: input, shape index: {}]   ;;  %s4991_s3 = inlined_call_operand.vmem [shape: f32[1,64], index: 3, kind: input, shape index: {}]   ;;  %s4992_s4 = inlined_call_operand.vmem [shape: f32[2,128,64], index: 4, kind: output, shape index: {}]  }
   0x1 LB: > { %s2760_s16 = sadd.s32 4294967295, %s3645_s15   ;;  %p2764_p0 = scmp.ge.s32.totalorder %s3645_s15, 1  ;;  %s3645_s15 = sphi %s3681_s15, %s14_s15  }
   0x2   : > { %p162_p1 = scmp.lt.s32.totalorder %s3645_s15, 3 }
   0x4   : > { %p163_p2 = pnand %p2764_p0, %p162_p1 }
   0x6   : > { %166 = sbr.rel (%p163_p2) target bundleno = 2349 (0x92d), region = 36 }
   0xb   : > { %v3351_v0 = vld [vmem:[%s4989_s1 + $0x34] ss:$8 sps:$4 sm:$0xff]   ;;  %p188_p3 = scmp.lt.s32.totalorder %s2760_s16, 1  ;;  %v3353_v1 = vld [vmem:[%s4989_s1 + $0x30] ss:$8 sps:$4 sm:$0xff]   ;;  %v3647_v2 = vmov 0  }
   0xc   : > { %364 = vmatprep.mubr.bf16.mxu0 %v3647_v2  ;;  %340 = vmatprep.subr.bf16.mxu0 %v3351_v0  ;;  %v3354_v3 = vld [vmem:[%s4989_s1 + $0x24] ss:$8 sps:$4 sm:$0xff]   ;;  %v3356_v4 = vld [vmem:[%s4989_s1 + $0x20] ss:$8 sps:$4 sm:$0xff]   ;;  %v3357_v5 = vld [vmem:[%s4989_s1 + $0x14] ss:$8 sps:$4 sm:$0xff]  }
   0xd   : > { %s5138_s16 = smov (!%p188_p3, %s2760_s16), 1  ;;  %341 = vmatpush1.bf16.msra.mxu0 %v3353_v1  ;;  %v3359_v6 = vld [vmem:[%s4989_s1 + $0x10] ss:$8 sps:$4 sm:$0xff]   ;;  %v3360_v7 = vld [vmem:[%s4989_s1 + $0x4] ss:$8 sps:$4 sm:$0xff]   ;;  %vm307_vm0 = vcmask 523264  }
   0xe   : > { %342 = vmatprep.subr.bf16.mxu0 %v3354_v3  ;;  %s2864_s27 = sshll.u32 %s5138_s16, 6  ;;  %v3362_v8 = vld [vmem:[%s4989_s1] ss:$8 sps:$4 sm:$0xff]   ;;  %vm485_vm1 = vcmask 130048   ;;  %s3648_s11 = smov 64   ;;  %vm2383_vm3 = vcmask 392192  }
   0xf   : > { %s3710_s30 = scalar_lea.vmem %s4988_s0, %s2864_s27  ;;  %s3649_s12 = smov 48   ;;  %vm2366_vm4 = vcmask 261120   ;;  %vm2456_vm5 = vcmask 519168  }
  0x10   : > { %v3363_v9 = vld [vmem:[%s3710_s30] sm:$0xff]   ;;  %v3364_v10 = vld [vmem:[%s3710_s30 + $0x8] sm:$0xff]   ;;  %v3365_v11 = vld [vmem:[%s3710_s30 + $0x10] sm:$0xff]   ;;  %s3650_s13 = smov 112   ;;  %s3651_s14 = smov 32  }
  0x11   : > { %343 = vmatpush1.bf16.msra.mxu0 %v3356_v4  ;;  %v3366_v12 = vld [vmem:[%s3710_s30 + $0x18] sm:$0xff]   ;;  %v3367_v13 = vld [vmem:[%s3710_s30 + $0x20] sm:$0xff]   ;;  %v3368_v14 = vld [vmem:[%s3710_s30 + $0x28] sm:$0xff]   ;;  %s3653_s17 = smov 96   ;;  %s3654_s18 = smov 16  }
  0x12   : > { %344 = vmatprep.subr.bf16.mxu0 %v3357_v5  ;;  %v3369_v15 = vld [vmem:[%s3710_s30 + $0x30] sm:$0xff]   ;;  %v3370_v16 = vld [vmem:[%s3710_s30 + $0x38] sm:$0xff]   ;;  %s3655_s19 = smov 80   ;;  %s2865_s28 = sshll.u32 %s5138_s16, 7 }
  0x13   : > { %s4951_s7 = scalar_lea.vmem %s4992_s4, %s2865_s28 }
  0x15   : > { %345 = vmatpush1.bf16.msra.mxu0 %v3359_v6 }
  0x16   : > { %346 = vmatprep.subr.bf16.mxu0 %v3360_v7 }
  0x19   : > { %347 = vmatpush1.bf16.msra.mxu0 %v3362_v8 }
  0x1c   : > { %2785 = vmatmul.mubr.msk.bf16.vlgmr.msra.gmra.mxu0 %vm307_vm0, %v3363_v9 }
  0x1d   : > { %374 = vmatprep.mubr.bf16.mxu0 %v3647_v2 }
  0x24   : > { %2786 = vmatmul.mubr.msk.bf16.gmra.mxu0 %vm307_vm0, %v3364_v10 }
  0x25   : > { %384 = vmatprep.mubr.bf16.mxu0 %v3647_v2 }
  0x2c   : > { %2787 = vmatmul.mubr.msk.bf16.gmra.mxu0 %vm307_vm0, %v3365_v11 }
  0x2d   : > { %394 = vmatprep.mubr.bf16.mxu0 %v3647_v2 }
  0x34   : > { %2788 = vmatmul.mubr.msk.bf16.gmra.mxu0 %vm307_vm0, %v3366_v12 }
  0x35   : > { %404 = vmatprep.mubr.bf16.mxu0 %v3647_v2 }
  0x3c   : > { %2789 = vmatmul.mubr.msk.bf16.gmra.mxu0 %vm307_vm0, %v3367_v13 }
  0x3d   : > { %414 = vmatprep.mubr.bf16.mxu0 %v3647_v2 }
  0x44   : > { %2790 = vmatmul.mubr.msk.bf16.gmra.mxu0 %vm307_vm0, %v3368_v14 }
  0x45   : > { %424 = vmatprep.mubr.bf16.mxu0 %v3647_v2 }
  0x4c   : > { %2791 = vmatmul.mubr.msk.bf16.gmra.mxu0 %vm307_vm0, %v3369_v15 }
  0x4d   : > { %434 = vmatprep.mubr.bf16.mxu0 %v3647_v2 }
  0x54   : > { %2792 = vmatmul.mubr.msk.bf16.gmra.mxu0 %vm307_vm0, %v3370_v16 }
  0xdc   : > { %v366_v17 = vpop.f32.mrf.mxu0 }
  0xde   : > { %v368_v18 = vpop.f32.mrf.mxu0 }
  0xe0   : > { %v370_v19 = vpop.f32.mrf.mxu0 }
  0xe1   : > { %v3737_v20 = vpack.c.bf16 %v370_v19, %v366_v17 }
  0xe2   : > { %v372_v21 = vpop.f32.mrf.mxu0 }
  0xe3   : > { %v3739_v22 = vpack.c.bf16 %v372_v21, %v368_v18  ;;  %3022 = vmatprep.mubr.msk.bf16.mxu1 %vm485_vm1, %v3737_v20 }
  0xe4   : > { %v376_v23 = vpop.f32.mrf.mxu0 }
  0xe6   : > { %v378_v24 = vpop.f32.mrf.mxu0 }
  0xe8   : > { %v380_v25 = vpop.f32.mrf.mxu0 }
  0xe9   : > { %v3788_v61 = vpack.c.bf16 %v380_v25, %v376_v23 }
  0xea   : > { %v382_v26 = vpop.f32.mrf.mxu0 }
  0xeb   : > { %v3743_v27 = vpack.c.bf16 %v382_v26, %v378_v24 }
  0xec   : > { %v386_v28 = vpop.f32.mrf.mxu0 }
  0xee   : > { %v388_v29 = vpop.f32.mrf.mxu0 }
  0xf0   : > { %v390_v30 = vpop.f32.mrf.mxu0 }
  0xf1   : > { %v3753_v49 = vpack.c.bf16 %v390_v30, %v386_v28 }
  0xf2   : > { %v392_v31 = vpop.f32.mrf.mxu0 }
  0xf3   : > { %v3806_v0 = vpack.c.bf16 %v392_v31, %v388_v29 }
  0xf4   : > { %v396_v32 = vpop.f32.mrf.mxu0 }
  0xf6   : > { %v398_v33 = vpop.f32.mrf.mxu0 }
  0xf8   : > { %v400_v34 = vpop.f32.mrf.mxu0 }
  0xf9   : > { %v3778_v59 = vpack.c.bf16 %v400_v34, %v396_v32 }
  0xfa   : > { %v402_v35 = vpop.f32.mrf.mxu0 }
  0xfb   : > { %v3798_v63 = vpack.c.bf16 %v402_v35, %v398_v33 }
  0xfc   : > { %v406_v36 = vpop.f32.mrf.mxu0 }
  0xfe   : > { %v408_v37 = vpop.f32.mrf.mxu0 }
 0x100   : > { %v410_v38 = vpop.f32.mrf.mxu0 }
 0x101   : > { %v3749_v46 = vpack.c.bf16 %v410_v38, %v406_v36 }
 0x102   : > { %v412_v39 = vpop.f32.mrf.mxu0 }
 0x103   : > { %v3790_v62 = vpack.c.bf16 %v412_v39, %v408_v37 }
 0x104   : > { %v416_v40 = vpop.f32.mrf.mxu0 }
 0x106   : > { %v418_v41 = vpop.f32.mrf.mxu0 }
 0x108   : > { %v420_v42 = vpop.f32.mrf.mxu0 }
 0x109   : > { %v3745_v43 = vpack.c.bf16 %v420_v42, %v416_v40 }
 0x10a   : > { %v422_v44 = vpop.f32.mrf.mxu0 }
 0x10b   : > { %479 = vrot.lane.b32.xlu1 %v3745_v43, %s3648_s11  ;;  %v3780_v60 = vpack.c.bf16 %v422_v44, %v418_v41 }
 0x10c   : > { %v426_v45 = vpop.f32.mrf.mxu0 }
 0x10e   : > { %v428_v47 = vpop.f32.mrf.mxu0 }
 0x10f   : > { %477 = vrot.lane.b32.xlu1 %v3749_v46, %s3648_s11 }
 0x110   : > { %v430_v48 = vpop.f32.mrf.mxu0 }
 0x111   : > { %v3759_v54 = vpack.c.bf16 %v430_v48, %v426_v45 }
 0x112   : > { %v432_v50 = vpop.f32.mrf.mxu0 }
 0x113   : > { %473 = vrot.lane.b32.xlu1 %v3753_v49, %s3648_s11  ;;  %v3770_v58 = vpack.c.bf16 %v432_v50, %v428_v47 }
 0x114   : > { %v436_v51 = vpop.f32.mrf.mxu0 }
 0x116   : > { %v438_v52 = vpop.f32.mrf.mxu0 }
 0x117   : > { %469 = vrot.lane.b32.xlu1 %v3737_v20, %s3648_s11 }
 0x118   : > { %v440_v53 = vpop.f32.mrf.mxu0 }
 0x119   : > { %v3761_v55 = vpack.c.bf16 %v440_v53, %v436_v51 }
 0x11a   : > { %v442_v56 = vpop.f32.mrf.mxu0 }
 0x11b   : > { %v3763_v57 = vpack.c.bf16 %v442_v56, %v438_v52  ;;  %916 = vrot.lane.b32.xlu1 %v3759_v54, %s3649_s12  ;;  %483 = vrot.lane.b32.xlu0 %v3761_v55, %s3648_s11  ;;  %v215_v56 = vlaneseq }
 0x11d   : > { %3038 = vmatprep.subr.bf16.mxu0 %v3763_v57 }
 0x11e   : > { %3039 = vmatpush3.bf16.msra.mxu0 %v3763_v57 }
 0x11f   : > { %912 = vrot.lane.b32.xlu1 %v3749_v46, %s3649_s12  ;;  %481 = vrot.lane.b32.xlu0 %v3759_v54, %s3648_s11 }
 0x120   : > { %3040 = vmatprep.subr.bf16.mxu0 %v3770_v58 }
 0x122   : > { %3041 = vmatpush3.bf16.msra.mxu0 %v3770_v58 }
 0x123   : > { %908 = vrot.lane.b32.xlu1 %v3753_v49, %s3649_s12  ;;  %475 = vrot.lane.b32.xlu0 %v3778_v59, %s3648_s11 }
 0x124   : > { %3042 = vmatprep.subr.bf16.mxu0 %v3780_v60 }
 0x126   : > { %3043 = vmatpush3.bf16.msra.mxu0 %v3780_v60 }
 0x127   : > { %904 = vrot.lane.b32.xlu1 %v3737_v20, %s3649_s12  ;;  %471 = vrot.lane.b32.xlu0 %v3788_v61, %s3648_s11 }
 0x128   : > { %3044 = vmatprep.subr.bf16.mxu0 %v3790_v62 }
 0x12a   : > { %3045 = vmatpush3.bf16.msra.mxu0 %v3790_v62 }
 0x12b   : > { %890 = vrot.lane.b32.xlu1 %v3788_v61, %s3650_s13  ;;  %918 = vrot.lane.b32.xlu0 %v3761_v55, %s3649_s12 }
 0x12c   : > { %3046 = vmatprep.subr.bf16.mxu0 %v3798_v63 }
 0x12e   : > { %3047 = vmatpush3.bf16.msra.mxu0 %v3798_v63 }
 0x12f   : > { %894 = vrot.lane.b32.xlu1 %v3778_v59, %s3650_s13  ;;  %914 = vrot.lane.b32.xlu0 %v3745_v43, %s3649_s12 }
 0x130   : > { %3048 = vmatprep.subr.bf16.mxu0 %v3806_v0 }
 0x132   : > { %3049 = vmatpush3.bf16.msra.mxu0 %v3806_v0 }
 0x133   : > { %898 = vrot.lane.b32.xlu1 %v3745_v43, %s3650_s13  ;;  %910 = vrot.lane.b32.xlu0 %v3778_v59, %s3649_s12 }
 0x134   : > { %3050 = vmatprep.subr.bf16.mxu0 %v3743_v27 }
 0x136   : > { %3051 = vmatpush3.bf16.msra.mxu0 %v3743_v27 }
 0x137   : > { %902 = vrot.lane.b32.xlu1 %v3761_v55, %s3650_s13  ;;  %906 = vrot.lane.b32.xlu0 %v3788_v61, %s3649_s12 }
 0x138   : > { %3052 = vmatprep.subr.bf16.mxu0 %v3739_v22 }
 0x13a   : > { %3053 = vmatpush3.bf16.msra.mxu0 %v3739_v22 }
 0x13b   : > { %1203 = vrot.lane.b32.xlu1 %v3780_v60, %s3650_s13  ;;  %888 = vrot.lane.b32.xlu0 %v3737_v20, %s3650_s13 }
 0x13f   : > { %1201 = vrot.lane.b32.xlu1 %v3790_v62, %s3650_s13  ;;  %892 = vrot.lane.b32.xlu0 %v3753_v49, %s3650_s13 }
 0x143   : > { %1199 = vrot.lane.b32.xlu1 %v3798_v63, %s3650_s13  ;;  %896 = vrot.lane.b32.xlu0 %v3749_v46, %s3650_s13 }
 0x147   : > { %1197 = vrot.lane.b32.xlu1 %v3806_v0, %s3650_s13  ;;  %900 = vrot.lane.b32.xlu0 %v3759_v54, %s3650_s13 }
 0x14b   : > { %1193 = vrot.lane.b32.xlu1 %v3739_v22, %s3650_s13  ;;  %1205 = vrot.lane.b32.xlu0 %v3770_v58, %s3650_s13 }
 0x14f   : > { %1380 = vrot.lane.b32.xlu1 %v3745_v43, %s3651_s14  ;;  %1195 = vrot.lane.b32.xlu0 %v3743_v27, %s3650_s13 }
 0x153   : > { %1382 = vrot.lane.b32.xlu0 %v3759_v54, %s3651_s14  ;;  %1207 = vrot.lane.b32.xlu1 %v3763_v57, %s3650_s13 }
 0x157   : > { %1378 = vrot.lane.b32.xlu0 %v3749_v46, %s3651_s14 }
 0x15b   : > { %1384 = vrot.lane.b32.xlu0 %v3761_v55, %s3651_s14 }
 0x17d   : > { %v480_v1 = vpop.permute.xlu1 %479 }
 0x17e   : > { %v526_v14 = vsel %vm485_vm1, %v480_v1, 0 }
 0x181   : > { %v478_v2 = vpop.permute.xlu1 %477 }
 0x182   : > { %v523_v17 = vsel %vm485_vm1, %v478_v2, 0 }
 0x185   : > { %v474_v3 = vpop.permute.xlu1 %473 }
 0x186   : > { %v517_v26 = vsel %vm485_vm1, %v474_v3, 0 }
 0x189   : > { %v470_v4 = vpop.permute.xlu1 %469 }
 0x18a   : > { %v511_v34 = vsel %vm485_vm1, %v470_v4, 0 }
 0x18d   : > { %v917_v5 = vpop.permute.xlu1 %916  ;;  %v484_v6 = vpop.permute.xlu0 %483 }
 0x18e   : > { %3302 = vmatprep.subr.msk.bf16.mxu1 %vm485_vm1, %v484_v6  ;;  %v532_v7 = vsel %vm485_vm1, %v484_v6, 0  ;;  %v963_v38 = vsel %vm485_vm1, %v917_v5, 0 }
 0x18f   : > { %3007 = vmatpush3.bf16.xpose.msra.mxu1 %v532_v7 }
 0x191   : > { %v913_v8 = vpop.permute.xlu1 %912  ;;  %v482_v9 = vpop.permute.xlu0 %481 }
 0x192   : > { %3303 = vmatprep.subr.msk.bf16.mxu1 %vm485_vm1, %v482_v9  ;;  %v529_v11 = vsel %vm485_vm1, %v482_v9, 0  ;;  %v957_v44 = vsel %vm485_vm1, %v913_v8, 0 }
 0x195   : > { %v3862_v10 = vpop.permute.xlu1 %908  ;;  %v476_v18 = vpop.permute.xlu0 %475 }
 0x196   : > { %v520_v23 = vsel %vm485_vm1, %v476_v18, 0  ;;  %v951_v47 = vsel %vm485_vm1, %v3862_v10, 0 }
 0x197   : > { %3009 = vmatpush3.bf16.xpose.msra.mxu1 %v529_v11 }
 0x198   : > { %3304 = vmatprep.subr.msk.bf16.mxu1 %vm485_vm1, %v480_v1  ;;  %v216_v1 = vand.u32 127, %v215_v56 }
 0x199   : > { %v3866_v12 = vpop.permute.xlu1 %904  ;;  %v472_v28 = vpop.permute.xlu0 %471 }
 0x19a   : > { %v514_v31 = vsel %vm485_vm1, %v472_v28, 0  ;;  %v945_v50 = vsel %vm485_vm1, %v3866_v12, 0  ;;  %vm217_vm2 = vcmp.lt.s32.totalorder %v216_v1, 16 }
 0x19d   : > { %v3868_v13 = vpop.permute.xlu1 %890  ;;  %v919_v35 = vpop.permute.xlu0 %918 }
 0x19e   : > { %v966_v36 = vsel %vm485_vm1, %v919_v35, 0 }
 0x19f   : > { %3011 = vmatpush3.bf16.xpose.msra.mxu1 %v526_v14 }
 0x1a0   : > { %3305 = vmatprep.subr.msk.bf16.mxu1 %vm485_vm1, %v478_v2  ;;  %v3652_v2 = vmov -1e+30  }
 0x1a1   : > { %v3872_v15 = vpop.permute.xlu1 %894  ;;  %v915_v37 = vpop.permute.xlu0 %914 }
 0x1a2   : > { %v960_v40 = vsel %vm485_vm1, %v915_v37, 0 }
 0x1a5   : > { %v3874_v16 = vpop.permute.xlu1 %898  ;;  %v911_v39 = vpop.permute.xlu0 %910 }
 0x1a6   : > { %v954_v45 = vsel %vm485_vm1, %v911_v39, 0 }
 0x1a7   : > { %3013 = vmatpush3.bf16.xpose.msra.mxu1 %v523_v17 }
 0x1a8   : > { %3306 = vmatprep.subr.msk.bf16.mxu1 %vm485_vm1, %v476_v18 }
 0x1a9   : > { %v3878_v19 = vpop.permute.xlu1 %902  ;;  %v907_v41 = vpop.permute.xlu0 %906 }
 0x1aa   : > { %v948_v48 = vsel %vm485_vm1, %v907_v41, 0 }
 0x1ad   : > { %v3880_v21 = vpop.permute.xlu1 %1203  ;;  %v889_v42 = vpop.permute.xlu0 %888 }
 0x1af   : > { %3015 = vmatpush3.bf16.xpose.msra.mxu1 %v520_v23 }
 0x1b0   : > { %3307 = vmatprep.subr.msk.bf16.mxu1 %vm485_vm1, %v474_v3  ;;  %v3948_v3 = vsel %vm217_vm2, 0.0, %v3652_v2 }
 0x1b1   : > { %v3884_v24 = vpop.permute.xlu1 %1201  ;;  %v893_v51 = vpop.permute.xlu0 %892 }
 0x1b5   : > { %v3886_v25 = vpop.permute.xlu1 %1199  ;;  %v897_v52 = vpop.permute.xlu0 %896 }
 0x1b7   : > { %3017 = vmatpush3.bf16.xpose.msra.mxu1 %v517_v26 }
 0x1b8   : > { %3308 = vmatprep.subr.msk.bf16.mxu1 %vm485_vm1, %v472_v28 }
 0x1b9   : > { %v3890_v29 = vpop.permute.xlu1 %1197  ;;  %v901_v53 = vpop.permute.xlu0 %900 }
 0x1bd   : > { %v3892_v30 = vpop.permute.xlu1 %1193 }
 0x1bf   : > { %3019 = vmatpush3.bf16.xpose.msra.mxu1 %v514_v31 }
 0x1c0   : > { %3309 = vmatprep.subr.msk.bf16.mxu1 %vm485_vm1, %v470_v4 }
 0x1c1   : > { %v3896_v32 = vpop.permute.xlu1 %1380 }
 0x1c2   : > { %5009 = vst [vmem:[#allocation3_spill] sm:$0xff] %v3896_v32 }
 0x1c5   : > { %v3898_v33 = vpop.permute.xlu1 %1207 }
 0x1c6   : > { %3102 = vmatprep.subr.bf16.mxu0 %v3898_v33 }
 0x1c7   : > { %3021 = vmatpush3.bf16.xpose.msra.mxu1 %v511_v34 }
 0x1c8   : > { %3310 = vmatprep.subr.msk.bf16.mxu1 %vm485_vm1, %v919_v35 }
 0x1ce   : > { %3023 = vmatmul.mubr.msk.bf16.vlgmr.msra.gmra.mxu1 %vm485_vm1, %v3788_v61 }
 0x1cf   : > { %3026 = vmatprep.mubr.msk.bf16.mxu1 %vm485_vm1, %v3753_v49  ;;  %3071 = vmatpush3.bf16.xpose.msra.mxu1 %v966_v36 }
 0x1d0   : > { %3311 = vmatprep.subr.msk.bf16.mxu1 %vm485_vm1, %v917_v5 }
 0x1d6   : > { %3027 = vmatmul.mubr.msk.bf16.gmra.mxu1 %vm485_vm1, %v3778_v59 }
 0x1d7   : > { %3030 = vmatprep.mubr.msk.bf16.mxu1 %vm485_vm1, %v3749_v46  ;;  %3073 = vmatpush3.bf16.xpose.msra.mxu1 %v963_v38 }
 0x1d8   : > { %3312 = vmatprep.subr.msk.bf16.mxu1 %vm485_vm1, %v915_v37 }
 0x1de   : > { %3031 = vmatmul.mubr.msk.bf16.gmra.mxu1 %vm485_vm1, %v3745_v43 }
 0x1df   : > { %3034 = vmatprep.mubr.msk.bf16.mxu1 %vm485_vm1, %v3759_v54  ;;  %3075 = vmatpush3.bf16.xpose.msra.mxu1 %v960_v40 }
 0x1e0   : > { %3313 = vmatprep.subr.msk.bf16.mxu1 %vm485_vm1, %v913_v8 }
 0x1e6   : > { %3035 = vmatmul.mubr.msk.bf16.gmra.mxu1 %vm485_vm1, %v3761_v55 }
 0x1e7   : > { %3077 = vmatpush3.bf16.xpose.msra.mxu1 %v957_v44  ;;  %3086 = vmatprep.mubr.msk.bf16.mxu1 %vm485_vm1, %v889_v42 }
 0x1e8   : > { %3314 = vmatprep.subr.msk.bf16.mxu1 %vm485_vm1, %v911_v39 }
 0x1ef   : > { %3079 = vmatpush3.bf16.xpose.msra.mxu1 %v954_v45 }
 0x1f0   : > { %3315 = vmatprep.subr.msk.bf16.mxu1 %vm485_vm1, %v3862_v10 }
 0x1f7   : > { %3081 = vmatpush3.bf16.xpose.msra.mxu1 %v951_v47 }
 0x1f8   : > { %3316 = vmatprep.subr.msk.bf16.mxu1 %vm485_vm1, %v907_v41 }
 0x1ff   : > { %3083 = vmatpush3.bf16.xpose.msra.mxu1 %v948_v48 }
 0x200   : > { %3317 = vmatprep.subr.msk.bf16.mxu1 %vm485_vm1, %v3866_v12 }
 0x207   : > { %3085 = vmatpush3.bf16.xpose.msra.mxu1 %v945_v50 }
 0x20e   : > { %3087 = vmatmul.mubr.msk.bf16.vlgmr.msra.gmra.mxu1 %vm485_vm1, %v3868_v13 }
 0x20f   : > { %3090 = vmatprep.mubr.msk.bf16.mxu1 %vm485_vm1, %v893_v51 }
 0x216   : > { %3091 = vmatmul.mubr.msk.bf16.gmra.mxu1 %vm485_vm1, %v3872_v15 }
 0x217   : > { %3094 = vmatprep.mubr.msk.bf16.mxu1 %vm485_vm1, %v897_v52 }
 0x21e   : > { %3095 = vmatmul.mubr.msk.bf16.gmra.mxu1 %vm485_vm1, %v3874_v16 }
 0x21f   : > { %3098 = vmatprep.mubr.msk.bf16.mxu1 %vm485_vm1, %v901_v53 }
 0x226   : > { %3099 = vmatmul.mubr.msk.bf16.gmra.mxu1 %vm485_vm1, %v3878_v19 }
 0x28e   : > { %v3024_v4 = vpop.f32.mrf.mxu1 }
 0x28f   : > { %v3951_v5 = vadd.f32 %v3024_v4, %v3948_v3 }
 0x290   : > { %v568_v6 = vpop.f32.mrf.mxu1 }
 0x291   : > { %635 = vmax.xlane.f32.xlu0 %v3951_v5  ;;  %v3955_v8 = vadd.f32 %v568_v6, %v3948_v3 }
 0x292   : > { %v3025_v7 = vpop.f32.mrf.mxu1 }
 0x293   : > { %v3962_v12 = vadd.f32 %v3025_v7, %v3948_v3 }
 0x294   : > { %v571_v9 = vpop.f32.mrf.mxu1 }
 0x295   : > { %v3958_v10 = vadd.f32 %v571_v9, %v3948_v3  ;;  %631 = vmax.xlane.f32.xlu0 %v3955_v8 }
 0x296   : > { %v3028_v11 = vpop.f32.mrf.mxu1 }
 0x297   : > { %633 = vmax.xlane.f32.xlu1 %v3958_v10  ;;  %v3966_v14 = vadd.f32 %v3028_v11, %v3948_v3 }
 0x298   : > { %v584_v13 = vpop.f32.mrf.mxu1 }
 0x299   : > { %637 = vmax.xlane.f32.xlu0 %v3962_v12  ;;  %v3974_v18 = vadd.f32 %v584_v13, %v3948_v3 }
 0x29a   : > { %v3029_v15 = vpop.f32.mrf.mxu1 }
 0x29b   : > { %v3970_v16 = vadd.f32 %v3029_v15, %v3948_v3  ;;  %643 = vmax.xlane.f32.xlu1 %v3966_v14 }
 0x29c   : > { %v587_v17 = vpop.f32.mrf.mxu1 }
 0x29d   : > { %645 = vmax.xlane.f32.xlu0 %v3970_v16  ;;  %v3978_v23 = vadd.f32 %v587_v17, %v3948_v3 }
 0x29e   : > { %v3032_v19 = vpop.f32.mrf.mxu1 }
 0x29f   : > { %639 = vmax.xlane.f32.xlu1 %v3974_v18  ;;  %v3982_v28 = vadd.f32 %v3032_v19, %v3948_v3 }
 0x2a0   : > { %v600_v26 = vpop.f32.mrf.mxu1 }
 0x2a1   : > { %641 = vmax.xlane.f32.xlu0 %v3978_v23  ;;  %v3990_v36 = vadd.f32 %v600_v26, %v3948_v3 }
 0x2a2   : > { %v3033_v31 = vpop.f32.mrf.mxu1 }
 0x2a3   : > { %v3986_v34 = vadd.f32 %v3033_v31, %v3948_v3  ;;  %651 = vmax.xlane.f32.xlu1 %v3982_v28 }
 0x2a4   : > { %v603_v35 = vpop.f32.mrf.mxu1 }
 0x2a5   : > { %653 = vmax.xlane.f32.xlu0 %v3986_v34  ;;  %v3994_v38 = vadd.f32 %v603_v35, %v3948_v3 }
 0x2a6   : > { %v3036_v37 = vpop.f32.mrf.mxu1 }
 0x2a7   : > { %647 = vmax.xlane.f32.xlu1 %v3990_v36  ;;  %v3998_v40 = vadd.f32 %v3036_v37, %v3948_v3 }
 0x2a8   : > { %v616_v39 = vpop.f32.mrf.mxu1 }
 0x2a9   : > { %649 = vmax.xlane.f32.xlu0 %v3994_v38  ;;  %v4006_v45 = vadd.f32 %v616_v39, %v3948_v3 }
 0x2aa   : > { %v3037_v41 = vpop.f32.mrf.mxu1 }
 0x2ab   : > { %v4002_v42 = vadd.f32 %v3037_v41, %v3948_v3  ;;  %659 = vmax.xlane.f32.xlu1 %v3998_v40 }
 0x2ac   : > { %v619_v44 = vpop.f32.mrf.mxu1 }
 0x2ad   : > { %661 = vmax.xlane.f32.xlu0 %v4002_v42  ;;  %v4010_v47 = vadd.f32 %v619_v44, %v3948_v3 }
 0x2af   : > { %655 = vmax.xlane.f32.xlu1 %v4006_v45 }
 0x2b1   : > { %657 = vmax.xlane.f32.xlu0 %v4010_v47 }
 0x2ce   : > { %v3088_v48 = vpop.f32.mrf.mxu1 }
 0x2cf   : > { %v4015_v50 = vadd.f32 %v3088_v48, %v3948_v3  ;;  %v4064_v48 = vpop.permute.xlu0 %1205 }
 0x2d0   : > { %v1002_v51 = vpop.f32.mrf.mxu1 }
 0x2d1   : > { %v4018_v52 = vadd.f32 %v1002_v51, %v3948_v3  ;;  %1069 = vmax.xlane.f32.xlu0 %v4015_v50 }
 0x2d2   : > { %v3089_v53 = vpop.f32.mrf.mxu1 }
 0x2d3   : > { %v4022_v56 = vadd.f32 %v3089_v53, %v3948_v3  ;;  %1065 = vmax.xlane.f32.xlu1 %v4018_v52  ;;  %v4068_v51 = vpop.permute.xlu0 %1195 }
 0x2d4   : > { %v1005_v1 = vpop.f32.mrf.mxu1 }
 0x2d5   : > { %1071 = vmax.xlane.f32.xlu0 %v4022_v56  ;;  %v4027_v4 = vadd.f32 %v1005_v1, %v3948_v3 }
 0x2d6   : > { %v3092_v2 = vpop.f32.mrf.mxu1 }
 0x2d7   : > { %v4034_v11 = vadd.f32 %v3092_v2, %v3948_v3  ;;  %v4070_v53 = vpop.permute.xlu0 %1382 }
 0x2d8   : > { %v1018_v6 = vpop.f32.mrf.mxu1  ;;  %5014 = vst [vmem:[#allocation8_spill] sm:$0xff] %v4070_v53 }
 0x2d9   : > { %v4030_v7 = vadd.f32 %v1018_v6, %v3948_v3  ;;  %1067 = vmax.xlane.f32.xlu0 %v4027_v4 }
 0x2da   : > { %v3093_v9 = vpop.f32.mrf.mxu1 }
 0x2db   : > { %1073 = vmax.xlane.f32.xlu1 %v4030_v7  ;;  %v4038_v15 = vadd.f32 %v3093_v9, %v3948_v3  ;;  %v4072_v1 = vpop.permute.xlu0 %1378 }
 0x2dc   : > { %v1021_v13 = vpop.f32.mrf.mxu1  ;;  %5015 = vst [vmem:[#allocation9_spill] sm:$0xff] %v4072_v1 }
 0x2dd   : > { %1077 = vmax.xlane.f32.xlu0 %v4034_v11  ;;  %v4042_v19 = vadd.f32 %v1021_v13, %v3948_v3 }
 0x2de   : > { %v3096_v17 = vpop.f32.mrf.mxu1 }
 0x2df   : > { %1079 = vmax.xlane.f32.xlu1 %v4038_v15  ;;  %v4046_v26 = vadd.f32 %v3096_v17, %v3948_v3  ;;  %v4077_v13 = vpop.permute.xlu0 %1384 }
 0x2e0   : > { %v1034_v31 = vpop.f32.mrf.mxu1 }
 0x2e1   : > { %5010 = vst [vmem:[#allocation4_spill] sm:$0xff] %v4046_v26  ;;  %1075 = vmax.xlane.f32.xlu0 %v4042_v19  ;;  %v4051_v35 = vadd.f32 %v1034_v31, %v3948_v3 }
 0x2e2   : > { %v3097_v37 = vpop.f32.mrf.mxu1 }
 0x2e3   : > { %1085 = vmax.xlane.f32.xlu1 %v4046_v26  ;;  %5011 = vst [vmem:[#allocation5_spill] sm:$0xff] %v4051_v35  ;;  %v4055_v39 = vadd.f32 %v3097_v37, %v3948_v3 }
 0x2e4   : > { %v1037_v41 = vpop.f32.mrf.mxu1 }
 0x2e5   : > { %5012 = vst [vmem:[#allocation6_spill] sm:$0xff] %v4055_v39  ;;  %v4059_v44 = vadd.f32 %v1037_v41, %v3948_v3 }
 0x2e6   : > { %v3100_v2 = vpop.f32.mrf.mxu1 }
 0x2e7   : > { %1081 = vmax.xlane.f32.xlu1 %v4051_v35  ;;  %5013 = vst [vmem:[#allocation7_spill] sm:$0xff] %v4059_v44  ;;  %v4075_v6 = vadd.f32 %v3100_v2, %v3948_v3 }
 0x2e8   : > { %v1050_v9 = vpop.f32.mrf.mxu1 }
 0x2e9   : > { %5016 = vst [vmem:[#allocation10_spill] sm:$0xff] %v4075_v6  ;;  %v4081_v17 = vadd.f32 %v1050_v9, %v3948_v3 }
 0x2ea   : > { %v3101_v31 = vpop.f32.mrf.mxu1 }
 0x2eb   : > { %1087 = vmax.xlane.f32.xlu1 %v4055_v39  ;;  %5017 = vst [vmem:[#allocation11_spill] sm:$0xff] %v4081_v17  ;;  %v4085_v41 = vadd.f32 %v3101_v31, %v3948_v3 }
 0x2ec   : > { %v1053_v32 = vpop.f32.mrf.mxu1 }
 0x2ed   : > { %v4092_v26 = vadd.f32 %v1053_v32, %v3948_v3 }
 0x2ef   : > { %1083 = vmax.xlane.f32.xlu1 %v4059_v44 }
 0x2f7   : > { %1374 = vrot.lane.b32.xlu0 %v3753_v49, %s3651_s14 }
 0x300   : > { %1376 = vrot.lane.b32.xlu1 %v3778_v59, %s3651_s14 }
 0x316   : > { %1093 = vmax.xlane.f32.xlu0 %v4075_v6 }
 0x31a   : > { %1089 = vmax.xlane.f32.xlu0 %v4081_v17  ;;  %v636_v37 = vpop.xlane.xlu0 %635 }
 0x31b   : > { %v665_v1 = vsub.f32 %v3951_v5, %v636_v37 }
 0x31d   : > { %v683_v17 = vmul.f32 1.442695, %v665_v1 }
 0x31e   : > { %1095 = vmax.xlane.f32.xlu0 %v4085_v41  ;;  %v632_v2 = vpop.xlane.xlu0 %631 }
 0x31f   : > { %v663_v53 = vsub.f32 %v3955_v8, %v632_v2 }
 0x320   : > { %v634_v44 = vpop.xlane.xlu1 %633 }
 0x321   : > { %v679_v6 = vmul.f32 1.442695, %v663_v53  ;;  %v664_v9 = vsub.f32 %v3958_v10, %v634_v44 }
 0x322   : > { %v638_v39 = vpop.xlane.xlu0 %637 }
 0x323   : > { %v681_v35 = vmul.f32 1.442695, %v664_v9  ;;  %v666_v31 = vsub.f32 %v3962_v12, %v638_v39  ;;  %3383 = vpow2.f32 %v679_v6 }
 0x324   : > { %1091 = vmax.xlane.f32.xlu1 %v4092_v26  ;;  %v644_v5 = vpop.xlane.xlu1 %643 }
 0x325   : > { %3385 = vpow2.f32 %v681_v35  ;;  %v685_v37 = vmul.f32 1.442695, %v666_v31  ;;  %v669_v32 = vsub.f32 %v3966_v14, %v644_v5 }
 0x326   : > { %3387 = vpow2.f32 %v683_v17  ;;  %v646_v8 = vpop.xlane.xlu0 %645 }
 0x327   : > { %3389 = vpow2.f32 %v685_v37  ;;  %v670_v53 = vsub.f32 %v3970_v16, %v646_v8  ;;  %v691_v6 = vmul.f32 1.442695, %v669_v32 }
 0x328   : > { %v640_v10 = vpop.xlane.xlu1 %639 }
 0x329   : > { %v693_v44 = vmul.f32 1.442695, %v670_v53  ;;  %v667_v1 = vsub.f32 %v3974_v18, %v640_v10 }
 0x32a   : > { %v642_v2 = vpop.xlane.xlu0 %641 }
 0x32b   : > { %v687_v9 = vmul.f32 1.442695, %v667_v1  ;;  %v668_v12 = vsub.f32 %v3978_v23, %v642_v2  ;;  %3391 = vpow2.f32 %v693_v44 }
 0x32c   : > { %v652_v39 = vpop.xlane.xlu1 %651 }
 0x32d   : > { %v689_v35 = vmul.f32 1.442695, %v668_v12  ;;  %3393 = vpow2.f32 %v687_v9  ;;  %v673_v14 = vsub.f32 %v3982_v28, %v652_v39 }
 0x32e   : > { %v654_v17 = vpop.xlane.xlu0 %653 }
 0x32f   : > { %3395 = vpow2.f32 %v689_v35  ;;  %v674_v31 = vsub.f32 %v3986_v34, %v654_v17  ;;  %v699_v1 = vmul.f32 1.442695, %v673_v14 }
 0x330   : > { %v648_v16 = vpop.xlane.xlu1 %647  ;;  %v4101_v37 = vpop.eup %3383  ;;  %3397 = vpow2.f32 %v691_v6 }
 0x331   : > { %v701_v18 = vmul.f32 1.442695, %v674_v31  ;;  %v671_v5 = vsub.f32 %v3990_v36, %v648_v16 }
 0x332   : > { %v4105_v8 = vpop.eup %3385  ;;  %v650_v23 = vpop.xlane.xlu0 %649 }
 0x333   : > { %v4107_v53 = vpop.eup %3387  ;;  %v695_v10 = vmul.f32 1.442695, %v671_v5  ;;  %v672_v32 = vsub.f32 %v3994_v38, %v650_v23  ;;  %v743_v34 = vpack.c.bf16 %v4105_v8, %v4101_v37  ;;  %3399 = vpow2.f32 %v701_v18 }
 0x334   : > { %v4112_v44 = vpop.eup %3389  ;;  %1372 = vrot.lane.b32.xlu0 %v3788_v61, %s3651_s14  ;;  %v660_v28 = vpop.xlane.xlu1 %659 }
 0x335   : > { %v697_v36 = vmul.f32 1.442695, %v672_v32  ;;  %1370 = vrot.lane.b32.xlu1 %v3737_v20, %s3651_s14  ;;  %3054 = vmatprep.mubr.bf16.mxu0 %v743_v34  ;;  %v744_v2 = vpack.c.bf16 %v4112_v44, %v4107_v53  ;;  %3401 = vpow2.f32 %v695_v10  ;;  %v677_v39 = vsub.f32 %v3998_v40, %v660_v28 }
 0x336   : > { %v662_v38 = vpop.xlane.xlu0 %661 }
 0x337   : > { %3403 = vpow2.f32 %v697_v36  ;;  %v678_v9 = vsub.f32 %v4002_v42, %v662_v38  ;;  %3055 = vmatmul.mubr.bf16.vlgmr.msra.gmra.mxu0 %v744_v2  ;;  %v707_v40 = vmul.f32 1.442695, %v677_v39 }
 0x338   : > { %3103 = vmatpush3.bf16.msra.mxu0 %v3898_v33  ;;  %1354 = vrot.lane.b32.xlu0 %v3737_v20, %s3653_s17  ;;  %v656_v12 = vpop.xlane.xlu1 %655  ;;  %3405 = vpow2.f32 %v699_v1  ;;  %v4129_v42 = vpop.eup %3391 }
 0x339   : > { %v709_v6 = vmul.f32 1.442695, %v678_v9  ;;  %v675_v35 = vsub.f32 %v4006_v45, %v656_v12  ;;  %3104 = vmatprep.subr.bf16.mxu0 %v4064_v48  ;;  %1356 = vrot.lane.b32.xlu1 %v3788_v61, %s3653_s17 }
 0x33a   : > { %v658_v17 = vpop.xlane.xlu0 %657  ;;  %v4131_v33 = vpop.eup %3393 }
 0x33b   : > { %v703_v31 = vmul.f32 1.442695, %v675_v35  ;;  %v676_v16 = vsub.f32 %v4010_v47, %v658_v17  ;;  %3407 = vpow2.f32 %v709_v6 }
 0x33c   : > { %v4134_v14 = vpop.eup %3395  ;;  %3105 = vmatpush3.bf16.msra.mxu0 %v4064_v48  ;;  %1358 = vrot.lane.b32.xlu0 %v3753_v49, %s3653_s17 }
 0x33d   : > { %v705_v45 = vmul.f32 1.442695, %v676_v16  ;;  %3106 = vmatprep.subr.bf16.mxu0 %v3880_v21  ;;  %1360 = vrot.lane.b32.xlu1 %v3778_v59, %s3653_s17  ;;  %v745_v18 = vpack.c.bf16 %v4134_v14, %v4131_v33  ;;  %v4144_v5 = vpop.eup %3397  ;;  %3409 = vpow2.f32 %v703_v31 }
 0x33e   : > { %v746_v47 = vpack.c.bf16 %v4129_v42, %v4144_v5 }
 0x33f   : > { %3411 = vpow2.f32 %v705_v45  ;;  %3058 = vmatprep.mubr.bf16.mxu0 %v745_v18 }
 0x340   : > { %3107 = vmatpush3.bf16.msra.mxu0 %v3880_v21  ;;  %1362 = vrot.lane.b32.xlu0 %v3749_v46, %s3653_s17  ;;  %3413 = vpow2.f32 %v707_v40  ;;  %v4152_v48 = vpop.eup %3399 }
 0x341   : > { %3059 = vmatmul.mubr.bf16.gmra.mxu0 %v746_v47  ;;  %3108 = vmatprep.subr.bf16.mxu0 %v3884_v24  ;;  %5018 = vst [vmem:[#allocation12_spill] sm:$0xff] %v4152_v48 }
 0x342   : > { %1364 = vrot.lane.b32.xlu1 %v3745_v43, %s3653_s17  ;;  %v4156_v23 = vpop.eup %3401 }
 0x344   : > { %v4158_v10 = vpop.eup %3403  ;;  %3109 = vmatpush3.bf16.msra.mxu0 %v3884_v24  ;;  %1366 = vrot.lane.b32.xlu0 %v3759_v54, %s3653_s17 }
 0x345   : > { %5019 = vst [vmem:[#allocation13_spill] sm:$0xff] %v4158_v10  ;;  %3110 = vmatprep.subr.bf16.mxu0 %v3886_v25  ;;  %v747_v21 = vpack.c.bf16 %v4158_v10, %v4156_v23  ;;  %v4166_v32 = vpop.eup %3405 }
 0x346   : > { %5020 = vst [vmem:[#allocation14_spill] sm:$0xff] %v4166_v32  ;;  %1368 = vrot.lane.b32.xlu1 %v3761_v55, %s3653_s17  ;;  %v748_v34 = vpack.c.bf16 %v4152_v48, %v4166_v32 }
 0x347   : > { %3062 = vmatprep.mubr.bf16.mxu0 %v747_v21 }
 0x348   : > { %3111 = vmatpush3.bf16.msra.mxu0 %v3886_v25  ;;  %1665 = vrot.lane.b32.xlu0 %v3763_v57, %s3653_s17  ;;  %v4176_v24 = vpop.eup %3407 }
 0x349   : > { %3063 = vmatmul.mubr.bf16.gmra.mxu0 %v748_v34  ;;  %3112 = vmatprep.subr.bf16.mxu0 %v3890_v29  ;;  %5021 = vst [vmem:[#allocation15_spill] sm:$0xff] %v4176_v24 }
 0x34a   : > { %1663 = vrot.lane.b32.xlu1 %v3770_v58, %s3653_s17  ;;  %v4180_v28 = vpop.eup %3409 }
 0x34b   : > { %5022 = vst [vmem:[#allocation16_spill] sm:$0xff] %v4180_v28 }
 0x34c   : > { %v4182_v1 = vpop.eup %3411  ;;  %3113 = vmatpush3.bf16.msra.mxu0 %v3890_v29  ;;  %1661 = vrot.lane.b32.xlu0 %v3780_v60, %s3653_s17 }
 0x34d   : > { %5023 = vst [vmem:[#allocation17_spill] sm:$0xff] %v4182_v1  ;;  %3114 = vmatprep.subr.bf16.mxu0 %v4068_v51  ;;  %v749_v25 = vpack.c.bf16 %v4182_v1, %v4180_v28  ;;  %v4190_v36 = vpop.eup %3413 }
 0x34e   : > { %5024 = vst [vmem:[#allocation18_spill] sm:$0xff] %v4190_v36  ;;  %1655 = vrot.lane.b32.xlu1 %v3806_v0, %s3653_s17  ;;  %v750_v2 = vpack.c.bf16 %v4176_v24, %v4190_v36 }
 0x34f   : > { %3066 = vmatprep.mubr.bf16.mxu0 %v749_v25 }
 0x350   : > { %3115 = vmatpush3.bf16.msra.mxu0 %v4068_v51  ;;  %1659 = vrot.lane.b32.xlu0 %v3790_v62, %s3653_s17 }
 0x351   : > { %3067 = vmatmul.mubr.bf16.gmra.mxu0 %v750_v2  ;;  %3116 = vmatprep.subr.bf16.mxu0 %v3892_v30 }
 0x352   : > { %1651 = vrot.lane.b32.xlu1 %v3739_v22, %s3653_s17 }
 0x354   : > { %3117 = vmatpush3.bf16.msra.mxu0 %v3892_v30  ;;  %1657 = vrot.lane.b32.xlu0 %v3798_v63, %s3653_s17 }
 0x355   : > { %3318 = vmatprep.subr.msk.bf16.mxu0 %vm485_vm1, %v4077_v13 }
 0x356   : > { %1838 = vrot.lane.b32.xlu1 %v3745_v43, %s3654_s18 }
 0x358   : > { %1653 = vrot.lane.b32.xlu0 %v3743_v27, %s3653_s17 }
 0x35a   : > { %v1070_v29 = vpop.xlane.xlu0 %1069 }
 0x35b   : > { %v1099_v12 = vsub.f32 %v4015_v50, %v1070_v29 }
 0x35c   : > { %1842 = vrot.lane.b32.xlu0 %v3761_v55, %s3654_s18  ;;  %v1066_v51 = vpop.xlane.xlu1 %1065 }
 0x35d   : > { %v1097_v30 = vsub.f32 %v4018_v52, %v1066_v51  ;;  %v1117_v31 = vmul.f32 1.442695, %v1099_v12 }
 0x35e   : > { %v1072_v38 = vpop.xlane.xlu0 %1071 }
 0x35f   : > { %v1100_v9 = vsub.f32 %v4022_v56, %v1072_v38  ;;  %v1113_v39 = vmul.f32 1.442695, %v1097_v30 }
 0x360   : > { %1840 = vrot.lane.b32.xlu0 %v3759_v54, %s3654_s18 }
 0x361   : > { %v1119_v6 = vmul.f32 1.442695, %v1100_v9  ;;  %3415 = vpow2.f32 %v1113_v39 }
 0x362   : > { %v1068_v35 = vpop.xlane.xlu0 %1067 }
 0x363   : > { %v1098_v17 = vsub.f32 %v4027_v4, %v1068_v35  ;;  %3417 = vpow2.f32 %v1119_v6  ;;  %v5027_v35 = vld [vmem:[#allocation4_spill] sm:$0xff] }
 0x364   : > { %1836 = vrot.lane.b32.xlu0 %v3749_v46, %s3654_s18  ;;  %v1074_v16 = vpop.xlane.xlu1 %1073 }
 0x365   : > { %v1115_v52 = vmul.f32 1.442695, %v1098_v17  ;;  %v1101_v40 = vsub.f32 %v4030_v7, %v1074_v16 }
 0x366   : > { %v1078_v56 = vpop.xlane.xlu0 %1077 }
 0x367   : > { %3419 = vpow2.f32 %v1115_v52  ;;  %v1103_v50 = vsub.f32 %v4034_v11, %v1078_v56  ;;  %v1121_v18 = vmul.f32 1.442695, %v1101_v40  ;;  %v5025_v11 = vld [vmem:[#allocation5_spill] sm:$0xff]  ;;  %v1432_v56 = vsel %vm485_vm1, %v4077_v13, 0 }
 0x368   : > { %3421 = vpow2.f32 %v1117_v31  ;;  %v1080_v45 = vpop.xlane.xlu1 %1079 }
 0x369   : > { %v1104_v47 = vsub.f32 %v4038_v15, %v1080_v45  ;;  %v1125_v25 = vmul.f32 1.442695, %v1103_v50  ;;  %3423 = vpow2.f32 %v1121_v18  ;;  %v5028_v50 = vld [vmem:[#allocation7_spill] sm:$0xff] }
 0x36a   : > { %v1076_v4 = vpop.xlane.xlu0 %1075 }
 0x36b   : > { %v1127_v21 = vmul.f32 1.442695, %v1104_v47  ;;  %v1102_v34 = vsub.f32 %v4042_v19, %v1076_v4  ;;  %v5026_v19 = vld [vmem:[#allocation6_spill] sm:$0xff]  ;;  %v5029_v4 = vld [vmem:[#allocation8_spill] sm:$0xff] }
 0x36c   : > { %v1086_v2 = vpop.xlane.xlu1 %1085 }
 0x36d   : > { %v1123_v29 = vmul.f32 1.442695, %v1102_v34  ;;  %3425 = vpow2.f32 %v1127_v21  ;;  %v1107_v17 = vsub.f32 %v5027_v35, %v1086_v2 }
 0x36e   : > { %v4225_v51 = vpop.eup %3415 }
 0x36f   : > { %3427 = vpow2.f32 %v1123_v29  ;;  %v1133_v47 = vmul.f32 1.442695, %v1107_v17 }
 0x370   : > { %3429 = vpow2.f32 %v1125_v25  ;;  %v1082_v7 = vpop.xlane.xlu1 %1081  ;;  %v4227_v30 = vpop.eup %3417 }
 0x371   : > { %v1105_v38 = vsub.f32 %v5025_v11, %v1082_v7  ;;  %v1429_v7 = vsel %vm485_vm1, %v5029_v4, 0  ;;  %v5030_v11 = vld [vmem:[#allocation3_spill] sm:$0xff] }
 0x373   : > { %v1129_v16 = vmul.f32 1.442695, %v1105_v38 }
 0x374   : > { %v4230_v9 = vpop.eup %3419  ;;  %v1088_v15 = vpop.xlane.xlu1 %1087 }
 0x375   : > { %v4232_v12 = vpop.eup %3421  ;;  %v1108_v39 = vsub.f32 %v5026_v19, %v1088_v15  ;;  %v1177_v6 = vpack.c.bf16 %v4230_v9, %v4225_v51  ;;  %3431 = vpow2.f32 %v1129_v16  ;;  %v1426_v15 = vsel %vm485_vm1, %v5030_v11, 0 }
 0x376   : > { %v1178_v31 = vpack.c.bf16 %v4227_v30, %v4232_v12  ;;  %v4243_v18 = vpop.eup %3423 }
 0x377   : > { %3118 = vmatprep.mubr.bf16.mxu0 %v1177_v6  ;;  %v1135_v52 = vmul.f32 1.442695, %v1108_v39  ;;  %v5031_v6 = vld [vmem:[#allocation9_spill] sm:$0xff] }
 0x378   : > { %v1084_v40 = vpop.xlane.xlu1 %1083  ;;  %3119 = vmatmul.mubr.bf16.vlgmr.msra.gmra.mxu0 %v1178_v31  ;;  %v1423_v16 = vsel %vm485_vm1, %v5031_v6, 0 }
 0x379   : > { %v1106_v45 = vsub.f32 %v5028_v50, %v1084_v40  ;;  %3135 = vmatpush3.bf16.xpose.msra.mxu0 %v1432_v56  ;;  %3433 = vpow2.f32 %v1135_v52  ;;  %v1375_v56 = vpop.permute.xlu0 %1374 }
 0x37a   : > { %3319 = vmatprep.subr.msk.bf16.mxu0 %vm485_vm1, %v5029_v4  ;;  %v4247_v21 = vpop.eup %3425 }
 0x37b   : > { %v1131_v34 = vmul.f32 1.442695, %v1106_v45  ;;  %v1417_v45 = vsel %vm485_vm1, %v1375_v56, 0 }
 0x37c   : > { %v4249_v25 = vpop.eup %3427  ;;  %v1377_v52 = vpop.permute.xlu1 %1376 }
 0x37d   : > { %v4251_v2 = vpop.eup %3429  ;;  %3435 = vpow2.f32 %v1131_v34  ;;  %v1179_v13 = vpack.c.bf16 %v4249_v25, %v4243_v18  ;;  %v1420_v40 = vsel %vm485_vm1, %v1377_v52, 0  ;;  %v5032_v34 = vld [vmem:[#allocation11_spill] sm:$0xff] }
 0x37e   : > { %3437 = vpow2.f32 %v1133_v47  ;;  %v1180_v29 = vpack.c.bf16 %v4247_v21, %v4251_v2 }
 0x37f   : > { %3122 = vmatprep.mubr.bf16.mxu0 %v1179_v13 }
 0x380   : > { %3123 = vmatmul.mubr.bf16.gmra.mxu0 %v1180_v29 }
 0x381   : > { %3137 = vmatpush3.bf16.xpose.msra.mxu0 %v1429_v7  ;;  %v5033_v7 = vld [vmem:[#allocation10_spill] sm:$0xff] }
 0x382   : > { %3320 = vmatprep.subr.msk.bf16.mxu0 %vm485_vm1, %v5030_v11  ;;  %v4261_v38 = vpop.eup %3431 }
 0x386   : > { %v4265_v19 = vpop.eup %3433 }
 0x389   : > { %3139 = vmatpush3.bf16.xpose.msra.mxu0 %v1426_v15 }
 0x38a   : > { %v4267_v39 = vpop.eup %3435  ;;  %3321 = vmatprep.subr.msk.bf16.mxu0 %vm485_vm1, %v5031_v6 }
 0x38b   : > { %v4271_v35 = vpop.eup %3437  ;;  %v1181_v17 = vpack.c.bf16 %v4267_v39, %v4261_v38 }
 0x38c   : > { %v1182_v31 = vpack.c.bf16 %v4265_v19, %v4271_v35 }
 0x38d   : > { %3126 = vmatprep.mubr.bf16.mxu0 %v1181_v17 }
 0x38e   : > { %3127 = vmatmul.mubr.bf16.gmra.mxu0 %v1182_v31 }
 0x391   : > { %3141 = vmatpush3.bf16.xpose.msra.mxu0 %v1423_v16 }
 0x392   : > { %3322 = vmatprep.subr.msk.bf16.mxu0 %vm485_vm1, %v1377_v52 }
 0x399   : > { %3143 = vmatpush3.bf16.xpose.msra.mxu0 %v1420_v40 }
 0x39a   : > { %3323 = vmatprep.subr.msk.bf16.mxu0 %vm485_vm1, %v1375_v56 }
 0x39f   : > { %v1094_v50 = vpop.xlane.xlu0 %1093 }
 0x3a0   : > { %v1111_v11 = vsub.f32 %v5033_v7, %v1094_v50 }
 0x3a1   : > { %3145 = vmatpush3.bf16.xpose.msra.mxu0 %v1417_v45 }
 0x3a2   : > { %v1141_v40 = vmul.f32 1.442695, %v1111_v11 }
 0x3a3   : > { %v1090_v47 = vpop.xlane.xlu0 %1089 }
 0x3a4   : > { %v1109_v13 = vsub.f32 %v5032_v34, %v1090_v47 }
 0x3a6   : > { %v1137_v6 = vmul.f32 1.442695, %v1109_v13 }
 0x3a7   : > { %v1096_v4 = vpop.xlane.xlu0 %1095 }
 0x3a8   : > { %v1112_v29 = vsub.f32 %v4085_v41, %v1096_v4  ;;  %3439 = vpow2.f32 %v1137_v6 }
 0x3aa   : > { %v1143_v31 = vmul.f32 1.442695, %v1112_v29 }
 0x3ab   : > { %v1373_v15 = vpop.permute.xlu0 %1372 }
 0x3ac   : > { %3324 = vmatprep.subr.msk.bf16.mxu0 %vm485_vm1, %v1373_v15  ;;  %v1414_v17 = vsel %vm485_vm1, %v1373_v15, 0  ;;  %3441 = vpow2.f32 %v1143_v31 }
 0x3ad   : > { %v1092_v16 = vpop.xlane.xlu1 %1091  ;;  %3147 = vmatpush3.bf16.xpose.msra.mxu0 %v1414_v17 }
 0x3ae   : > { %v1110_v52 = vsub.f32 %v4092_v26, %v1092_v16 }
 0x3af   : > { %v1355_v56 = vpop.permute.xlu0 %1354 }
 0x3b0   : > { %v1139_v45 = vmul.f32 1.442695, %v1110_v52 }
 0x3b1   : > { %v1371_v47 = vpop.permute.xlu1 %1370 }
 0x3b2   : > { %3443 = vpow2.f32 %v1139_v45  ;;  %3325 = vmatprep.subr.msk.bf16.mxu0 %vm485_vm1, %v1371_v47  ;;  %v1411_v50 = vsel %vm485_vm1, %v1371_v47, 0 }
 0x3b3   : > { %3445 = vpow2.f32 %v1141_v40  ;;  %v1359_v41 = vpop.permute.xlu0 %1358 }
 0x3b5   : > { %v1357_v4 = vpop.permute.xlu1 %1356  ;;  %3149 = vmatpush3.bf16.xpose.msra.mxu0 %v1411_v50  ;;  %v4291_v7 = vpop.eup %3439 }
 0x3b7   : > { %v1363_v34 = vpop.permute.xlu0 %1362 }
 0x3b9   : > { %v1361_v13 = vpop.permute.xlu1 %1360  ;;  %v4293_v11 = vpop.eup %3441 }
 0x3bb   : > { %v1367_v29 = vpop.permute.xlu0 %1366 }
 0x3bd   : > { %v1365_v26 = vpop.permute.xlu1 %1364 }
 0x3bf   : > { %v4295_v15 = vpop.eup %3443  ;;  %v1666_v6 = vpop.permute.xlu0 %1665 }
 0x3c0   : > { %v4297_v17 = vpop.eup %3445  ;;  %3166 = vmatprep.subr.bf16.mxu1 %v1666_v6  ;;  %v1183_v31 = vpack.c.bf16 %v4295_v15, %v4291_v7 }
 0x3c1   : > { %3167 = vmatpush3.bf16.msra.mxu1 %v1666_v6  ;;  %v1369_v16 = vpop.permute.xlu1 %1368  ;;  %v1184_v52 = vpack.c.bf16 %v4293_v11, %v4297_v17 }
 0x3c2   : > { %3130 = vmatprep.mubr.bf16.mxu0 %v1183_v31 }
 0x3c3   : > { %v1662_v40 = vpop.permute.xlu0 %1661  ;;  %3131 = vmatmul.mubr.bf16.gmra.mxu0 %v1184_v52 }
 0x3c4   : > { %3150 = vmatprep.mubr.msk.bf16.mxu0 %vm485_vm1, %v1355_v56 }
 0x3c5   : > { %v1664_v45 = vpop.permute.xlu1 %1663 }
 0x3c6   : > { %3168 = vmatprep.subr.bf16.mxu1 %v1664_v45 }
 0x3c7   : > { %3169 = vmatpush3.bf16.msra.mxu1 %v1664_v45  ;;  %v1660_v47 = vpop.permute.xlu0 %1659 }
 0x3c8   : > { %3170 = vmatprep.subr.bf16.mxu1 %v1662_v40 }
 0x3c9   : > { %v1656_v6 = vpop.permute.xlu1 %1655 }
 0x3cb   : > { %3151 = vmatmul.mubr.msk.bf16.vlgmr.msra.gmra.mxu0 %vm485_vm1, %v1357_v4  ;;  %3171 = vmatpush3.bf16.msra.mxu1 %v1662_v40  ;;  %v1658_v50 = vpop.permute.xlu0 %1657 }
 0x3cc   : > { %3154 = vmatprep.mubr.msk.bf16.mxu0 %vm485_vm1, %v1359_v41  ;;  %3172 = vmatprep.subr.bf16.mxu1 %v1660_v47 }
 0x3cd   : > { %v1652_v31 = vpop.permute.xlu1 %1651 }
 0x3cf   : > { %3173 = vmatpush3.bf16.msra.mxu1 %v1660_v47  ;;  %v1654_v56 = vpop.permute.xlu0 %1653 }
 0x3d0   : > { %3174 = vmatprep.subr.bf16.mxu1 %v1658_v50 }
 0x3d3   : > { %3155 = vmatmul.mubr.msk.bf16.gmra.mxu0 %vm485_vm1, %v1361_v13  ;;  %3175 = vmatpush3.bf16.msra.mxu1 %v1658_v50  ;;  %v4310_v41 = vpop.permute.xlu0 %1842 }
 0x3d4   : > { %3158 = vmatprep.mubr.msk.bf16.mxu0 %vm485_vm1, %v1363_v34  ;;  %3176 = vmatprep.subr.bf16.mxu1 %v1656_v6 }
 0x3d7   : > { %3177 = vmatpush3.bf16.msra.mxu1 %v1656_v6 }
 0x3d8   : > { %3178 = vmatprep.subr.bf16.mxu1 %v1654_v56 }
 0x3db   : > { %3159 = vmatmul.mubr.msk.bf16.gmra.mxu0 %vm485_vm1, %v1365_v26  ;;  %3179 = vmatpush3.bf16.msra.mxu1 %v1654_v56 }
 0x3dc   : > { %3162 = vmatprep.mubr.msk.bf16.mxu0 %vm485_vm1, %v1367_v29  ;;  %3180 = vmatprep.subr.bf16.mxu1 %v1652_v31 }
 0x3df   : > { %3181 = vmatpush3.bf16.msra.mxu1 %v1652_v31 }
 0x3e0   : > { %3326 = vmatprep.subr.msk.bf16.mxu1 %vm485_vm1, %v4310_v41 }
 0x3e3   : > { %3163 = vmatmul.mubr.msk.bf16.gmra.mxu0 %vm485_vm1, %v1369_v16 }
 0x3f7   : > { %v4315_v4 = vpop.f32.mrf.mxu0 }
 0x3f8   : > { %5034 = vst [vmem:[#allocation5_spill] sm:$0xff] %v4315_v4 }
 0x3f9   : > { %v4317_v34 = vpop.f32.mrf.mxu0 }
 0x3fa   : > { %5035 = vst [vmem:[#allocation6_spill] sm:$0xff] %v4317_v34 }
 0x3fb   : > { %v4319_v13 = vpop.f32.mrf.mxu0 }
 0x3fc   : > { %5036 = vst [vmem:[#allocation4_spill] sm:$0xff] %v4319_v13 }
 0x3fd   : > { %v4321_v52 = vpop.f32.mrf.mxu0 }
 0x3fe   : > { %5037 = vst [vmem:[#allocation7_spill] sm:$0xff] %v4321_v52 }
 0x401   : > { %v4323_v26 = vpop.f32.mrf.mxu0 }
 0x402   : > { %5038 = vst [vmem:[#allocation8_spill] sm:$0xff] %v4323_v26 }
 0x403   : > { %v4325_v29 = vpop.f32.mrf.mxu0 }
 0x404   : > { %5039 = vst [vmem:[#allocation3_spill] sm:$0xff] %v4325_v29 }
 0x405   : > { %v4327_v40 = vpop.f32.mrf.mxu0 }
 0x406   : > { %5040 = vst [vmem:[#allocation9_spill] sm:$0xff] %v4327_v40 }
 0x407   : > { %v4329_v45 = vpop.f32.mrf.mxu0 }
 0x408   : > { %5041 = vst [vmem:[#allocation11_spill] sm:$0xff] %v4329_v45 }
 0x409   : > { %v4331_v47 = vpop.f32.mrf.mxu0 }
 0x40a   : > { %5042 = vst [vmem:[#allocation10_spill] sm:$0xff] %v4331_v47 }
 0x40b   : > { %v4333_v50 = vpop.f32.mrf.mxu0 }
 0x40c   : > { %5043 = vst [vmem:[#allocation19_spill] sm:$0xff] %v4333_v50 }
 0x40d   : > { %v4335_v16 = vpop.f32.mrf.mxu0 }
 0x40e   : > { %5044 = vst [vmem:[#allocation20_spill] sm:$0xff] %v4335_v16 }
 0x40f   : > { %v4337_v6 = vpop.f32.mrf.mxu0 }
 0x410   : > { %5045 = vst [vmem:[#allocation21_spill] sm:$0xff] %v4337_v6 }
 0x411   : > { %v4339_v56 = vpop.f32.mrf.mxu0 }
 0x412   : > { %5046 = vst [vmem:[#allocation22_spill] sm:$0xff] %v4339_v56 }
 0x413   : > { %v4341_v31 = vpop.f32.mrf.mxu0 }
 0x414   : > { %5047 = vst [vmem:[#allocation23_spill] sm:$0xff] %v4341_v31 }
 0x415   : > { %v4343_v13 = vpop.f32.mrf.mxu0 }
 0x416   : > { %5048 = vst [vmem:[#allocation24_spill] sm:$0xff] %v4343_v13 }
 0x417   : > { %v4345_v26 = vpop.f32.mrf.mxu0 }
 0x418   : > { %5049 = vst [vmem:[#allocation25_spill] sm:$0xff] %v4345_v26 }
 0x438   : > { %v4347_v29 = vpop.f32.mrf.mxu0 }
 0x439   : > { %5050 = vst [vmem:[#allocation26_spill] sm:$0xff] %v4347_v29 }
 0x43a   : > { %v4349_v40 = vpop.f32.mrf.mxu0 }
 0x43b   : > { %5051 = vst [vmem:[#allocation27_spill] sm:$0xff] %v4349_v40 }
 0x43c   : > { %v4351_v45 = vpop.f32.mrf.mxu0 }
 0x43d   : > { %5052 = vst [vmem:[#allocation28_spill] sm:$0xff] %v4351_v45 }
 0x43e   : > { %v4353_v47 = vpop.f32.mrf.mxu0 }
 0x43f   : > { %5053 = vst [vmem:[#allocation29_spill] sm:$0xff] %v4353_v47 }
 0x440   : > { %v4355_v50 = vpop.f32.mrf.mxu0 }
 0x441   : > { %5054 = vst [vmem:[#allocation30_spill] sm:$0xff] %v4355_v50 }
 0x442   : > { %v4357_v16 = vpop.f32.mrf.mxu0 }
 0x443   : > { %5055 = vst [vmem:[#allocation31_spill] sm:$0xff] %v4357_v16 }
 0x444   : > { %v4359_v6 = vpop.f32.mrf.mxu0 }
 0x445   : > { %5056 = vst [vmem:[#allocation32_spill] sm:$0xff] %v4359_v6 }
 0x446   : > { %v4361_v56 = vpop.f32.mrf.mxu0 }
 0x447   : > { %5057 = vst [vmem:[#allocation33_spill] sm:$0xff] %v4361_v56 }
 0x44e   : > { %v4363_v31 = vpop.f32.mrf.mxu0 }
 0x44f   : > { %5058 = vst [vmem:[#allocation34_spill] sm:$0xff] %v4363_v31 }
 0x450   : > { %v4365_v13 = vpop.f32.mrf.mxu0 }
 0x451   : > { %5059 = vst [vmem:[#allocation35_spill] sm:$0xff] %v4365_v13 }
 0x452   : > { %v4367_v26 = vpop.f32.mrf.mxu0 }
 0x453   : > { %5060 = vst [vmem:[#allocation36_spill] sm:$0xff] %v4367_v26 }
 0x454   : > { %v4369_v4 = vpop.f32.mrf.mxu0 }
 0x455   : > { %5061 = vst [vmem:[#allocation37_spill] sm:$0xff] %v4369_v4 }
 0x483   : > { %v4371_v52 = vpop.f32.mrf.mxu0 }
 0x484   : > { %5062 = vst [vmem:[#allocation38_spill] sm:$0xff] %v4371_v52 }
 0x485   : > { %v4373_v34 = vpop.f32.mrf.mxu0 }
 0x486   : > { %5063 = vst [vmem:[#allocation39_spill] sm:$0xff] %v4373_v34 }
 0x487   : > { %v4375_v45 = vpop.f32.mrf.mxu0 }
 0x488   : > { %5064 = vst [vmem:[#allocation40_spill] sm:$0xff] %v4375_v45 }
 0x489   : > { %v4377_v50 = vpop.f32.mrf.mxu0 }
 0x48a   : > { %5065 = vst [vmem:[#allocation41_spill] sm:$0xff] %v4377_v50 }
 0x48b   : > { %v3152_v16 = vpop.f32.mrf.mxu0 }
 0x48c   : > { %v4380_v6 = vadd.f32 %v3152_v16, %v3948_v3 }
 0x48d   : > { %v1468_v56 = vpop.f32.mrf.mxu0 }
 0x48e   : > { %v4383_v31 = vadd.f32 %v1468_v56, %v3948_v3  ;;  %1535 = vmax.xlane.f32.xlu1 %v4380_v6 }
 0x48f   : > { %v3153_v26 = vpop.f32.mrf.mxu0 }
 0x490   : > { %v4387_v4 = vadd.f32 %v3153_v26, %v3948_v3  ;;  %1531 = vmax.xlane.f32.xlu0 %v4383_v31 }
 0x491   : > { %v1471_v34 = vpop.f32.mrf.mxu0 }
 0x492   : > { %1537 = vmax.xlane.f32.xlu1 %v4387_v4  ;;  %v4392_v52 = vadd.f32 %v1471_v34, %v3948_v3 }
 0x493   : > { %v3156_v50 = vpop.f32.mrf.mxu0 }
 0x494   : > { %v4395_v16 = vadd.f32 %v3156_v50, %v3948_v3 }
 0x495   : > { %v1484_v56 = vpop.f32.mrf.mxu0 }
 0x496   : > { %1533 = vmax.xlane.f32.xlu1 %v4392_v52  ;;  %1543 = vmax.xlane.f32.xlu0 %v4395_v16  ;;  %v4400_v26 = vadd.f32 %v1484_v56, %v3948_v3 }
 0x497   : > { %v3157_v45 = vpop.f32.mrf.mxu0 }
 0x498   : > { %v4407_v34 = vadd.f32 %v3157_v45, %v3948_v3 }
 0x499   : > { %v1487_v13 = vpop.f32.mrf.mxu0 }
 0x49a   : > { %v4403_v29 = vadd.f32 %v1487_v13, %v3948_v3  ;;  %1539 = vmax.xlane.f32.xlu1 %v4400_v26 }
 0x49b   : > { %v3160_v50 = vpop.f32.mrf.mxu0 }
 0x49c   : > { %1541 = vmax.xlane.f32.xlu0 %v4403_v29  ;;  %v4412_v47 = vadd.f32 %v3160_v50, %v3948_v3 }
 0x49d   : > { %v1500_v40 = vpop.f32.mrf.mxu0 }
 0x49e   : > { %1545 = vmax.xlane.f32.xlu1 %v4407_v34  ;;  %v4416_v56 = vadd.f32 %v1500_v40, %v3948_v3 }
 0x49f   : > { %v3161_v13 = vpop.f32.mrf.mxu0 }
 0x4a0   : > { %v4420_v45 = vadd.f32 %v3161_v13, %v3948_v3 }
 0x4a1   : > { %v1503_v24 = vpop.f32.mrf.mxu0 }
 0x4a2   : > { %1551 = vmax.xlane.f32.xlu1 %v4412_v47  ;;  %v4424_v1 = vadd.f32 %v1503_v24, %v3948_v3 }
 0x4a3   : > { %v3164_v40 = vpop.f32.mrf.mxu0 }
 0x4a4   : > { %v4432_v50 = vadd.f32 %v3164_v40, %v3948_v3 }
 0x4a5   : > { %v1516_v13 = vpop.f32.mrf.mxu0 }
 0x4a6   : > { %1547 = vmax.xlane.f32.xlu1 %v4416_v56  ;;  %v4436_v36 = vadd.f32 %v1516_v13, %v3948_v3 }
 0x4a7   : > { %v3165_v24 = vpop.f32.mrf.mxu0 }
 0x4a8   : > { %v4440_v48 = vadd.f32 %v3165_v24, %v3948_v3 }
 0x4a9   : > { %v1519_v28 = vpop.f32.mrf.mxu0 }
 0x4aa   : > { %1553 = vmax.xlane.f32.xlu1 %v4420_v45  ;;  %v4444_v10 = vadd.f32 %v1519_v28, %v3948_v3 }
 0x4ae   : > { %1549 = vmax.xlane.f32.xlu1 %v4424_v1 }
 0x4b2   : > { %1832 = vrot.lane.b32.xlu0 %v3753_v49, %s3654_s18 }
 0x4bf   : > { %1834 = vrot.lane.b32.xlu1 %v3778_v59, %s3654_s18 }
 0x4d1   : > { %1559 = vmax.xlane.f32.xlu0 %v4432_v50 }
 0x4d5   : > { %1555 = vmax.xlane.f32.xlu0 %v4436_v36 }
 0x4d9   : > { %1561 = vmax.xlane.f32.xlu0 %v4440_v48 }
 0x4e3   : > { %1557 = vmax.xlane.f32.xlu1 %v4444_v10 }
 0x4ef   : > { %1830 = vrot.lane.b32.xlu0 %v3788_v61, %s3654_s18 }
 0x4f3   : > { %1812 = vrot.lane.b32.xlu0 %v3737_v20, %s3655_s19 }
 0x4f4   : > { %1828 = vrot.lane.b32.xlu1 %v3737_v20, %s3654_s18  ;;  %v4477_v20 = vpop.permute.xlu0 %1840 }
 0x4f7   : > { %1816 = vrot.lane.b32.xlu0 %v3753_v49, %s3655_s19 }
 0x4f8   : > { %1814 = vrot.lane.b32.xlu1 %v3788_v61, %s3655_s19 }
 0x4fb   : > { %1820 = vrot.lane.b32.xlu0 %v3749_v46, %s3655_s19  ;;  %v4483_v46 = vpop.permute.xlu0 %1836 }
 0x4fc   : > { %1818 = vrot.lane.b32.xlu1 %v3778_v59, %s3655_s19 }
 0x4ff   : > { %1824 = vrot.lane.b32.xlu0 %v3759_v54, %s3655_s19 }
 0x500   : > { %1822 = vrot.lane.b32.xlu1 %v3745_v43, %s3655_s19  ;;  %v4481_v43 = vpop.permute.xlu1 %1838 }
 0x503   : > { %2121 = vrot.lane.b32.xlu0 %v3770_v58, %s3655_s19 }
 0x504   : > { %1826 = vrot.lane.b32.xlu1 %v3761_v55, %s3655_s19 }
 0x507   : > { %2117 = vrot.lane.b32.xlu0 %v3790_v62, %s3655_s19 }
 0x508   : > { %2123 = vrot.lane.b32.xlu1 %v3763_v57, %s3655_s19 }
 0x50b   : > { %2113 = vrot.lane.b32.xlu0 %v3806_v0, %s3655_s19 }
 0x50c   : > { %2119 = vrot.lane.b32.xlu1 %v3780_v60, %s3655_s19 }
 0x510   : > { %2115 = vrot.lane.b32.xlu1 %v3798_v63, %s3655_s19 }
 0x517   : > { %v1536_v49 = vpop.xlane.xlu1 %1535 }
 0x518   : > { %v1565_v59 = vsub.f32 %v4380_v6, %v1536_v49 }
 0x519   : > { %v1532_v54 = vpop.xlane.xlu0 %1531 }
 0x51a   : > { %v1563_v55 = vsub.f32 %v4383_v31, %v1532_v54  ;;  %v1583_v63 = vmul.f32 1.442695, %v1565_v59 }
 0x51b   : > { %v1538_v57 = vpop.xlane.xlu1 %1537 }
 0x51c   : > { %v1566_v58 = vsub.f32 %v4387_v4, %v1538_v57  ;;  %v1579_v61 = vmul.f32 1.442695, %v1563_v55 }
 0x51e   : > { %v1585_v60 = vmul.f32 1.442695, %v1566_v58  ;;  %3447 = vpow2.f32 %v1579_v61 }
 0x51f   : > { %v1534_v62 = vpop.xlane.xlu1 %1533  ;;  %v1544_v28 = vpop.xlane.xlu0 %1543 }
 0x520   : > { %v1564_v0 = vsub.f32 %v4392_v52, %v1534_v62  ;;  %3449 = vpow2.f32 %v1585_v60  ;;  %v1569_v13 = vsub.f32 %v4395_v16, %v1544_v28 }
 0x522   : > { %v1581_v40 = vmul.f32 1.442695, %v1564_v0  ;;  %v1591_v49 = vmul.f32 1.442695, %v1569_v13  ;;  %v1890_v13 = vsel %vm485_vm1, %v4310_v41, 0 }
 0x523   : > { %v1540_v24 = vpop.xlane.xlu1 %1539 }
 0x524   : > { %3451 = vpow2.f32 %v1581_v40  ;;  %v1567_v31 = vsub.f32 %v4400_v26, %v1540_v24 }
 0x525   : > { %3453 = vpow2.f32 %v1583_v63  ;;  %v1542_v4 = vpop.xlane.xlu0 %1541 }
 0x526   : > { %v1587_v54 = vmul.f32 1.442695, %v1567_v31  ;;  %v1568_v6 = vsub.f32 %v4403_v29, %v1542_v4 }
 0x527   : > { %v1546_v55 = vpop.xlane.xlu1 %1545 }
 0x528   : > { %v1589_v57 = vmul.f32 1.442695, %v1568_v6  ;;  %v1570_v52 = vsub.f32 %v4407_v34, %v1546_v55  ;;  %3455 = vpow2.f32 %v1587_v54 }
 0x52a   : > { %3457 = vpow2.f32 %v1589_v57  ;;  %v1593_v58 = vmul.f32 1.442695, %v1570_v52  ;;  %v1887_v52 = vsel %vm485_vm1, %v4477_v20, 0 }
 0x52b   : > { %3459 = vpow2.f32 %v1591_v49  ;;  %v1552_v59 = vpop.xlane.xlu1 %1551  ;;  %v4493_v16 = vpop.eup %3447 }
 0x52c   : > { %3461 = vpow2.f32 %v1593_v58  ;;  %v1573_v40 = vsub.f32 %v4412_v47, %v1552_v59 }
 0x52d   : > { %v4495_v26 = vpop.eup %3449 }
 0x52e   : > { %v1599_v41 = vmul.f32 1.442695, %v1573_v40 }
 0x52f   : > { %v1548_v61 = vpop.xlane.xlu1 %1547 }
 0x530   : > { %v1571_v29 = vsub.f32 %v4416_v56, %v1548_v61 }
 0x531   : > { %v4497_v60 = vpop.eup %3451 }
 0x532   : > { %v4499_v62 = vpop.eup %3453  ;;  %v1643_v34 = vpack.c.bf16 %v4497_v60, %v4493_v16  ;;  %v1595_v31 = vmul.f32 1.442695, %v1571_v29 }
 0x533   : > { %v1554_v0 = vpop.xlane.xlu1 %1553  ;;  %v1644_v28 = vpack.c.bf16 %v4495_v26, %v4499_v62 }
 0x534   : > { %v1574_v63 = vsub.f32 %v4420_v45, %v1554_v0  ;;  %3182 = vmatprep.mubr.bf16.mxu1 %v1643_v34  ;;  %3463 = vpow2.f32 %v1595_v31 }
 0x535   : > { %3183 = vmatmul.mubr.bf16.vlgmr.msra.gmra.mxu1 %v1644_v28  ;;  %v4510_v24 = vpop.eup %3455 }
 0x536   : > { %3199 = vmatpush3.bf16.xpose.msra.mxu1 %v1890_v13  ;;  %v1601_v4 = vmul.f32 1.442695, %v1574_v63  ;;  %v1833_v63 = vpop.permute.xlu0 %1832 }
 0x537   : > { %v4512_v56 = vpop.eup %3457  ;;  %3327 = vmatprep.subr.msk.bf16.mxu1 %vm485_vm1, %v4477_v20  ;;  %v1550_v54 = vpop.xlane.xlu1 %1549  ;;  %v1875_v13 = vsel %vm485_vm1, %v1833_v63, 0 }
 0x538   : > { %v4516_v6 = vpop.eup %3459  ;;  %v1572_v45 = vsub.f32 %v4424_v1, %v1550_v54  ;;  %v1645_v47 = vpack.c.bf16 %v4512_v56, %v4510_v24  ;;  %3465 = vpow2.f32 %v1601_v4  ;;  %v1884_v1 = vsel %vm485_vm1, %v4481_v43, 0 }
 0x539   : > { %v4521_v49 = vpop.eup %3461 }
 0x53a   : > { %v1597_v55 = vmul.f32 1.442695, %v1572_v45  ;;  %3186 = vmatprep.mubr.bf16.mxu1 %v1645_v47  ;;  %v1646_v57 = vpack.c.bf16 %v4521_v49, %v4516_v6 }
 0x53b   : > { %v1835_v0 = vpop.permute.xlu1 %1834 }
 0x53c   : > { %3467 = vpow2.f32 %v1597_v55  ;;  %v1878_v28 = vsel %vm485_vm1, %v1835_v0, 0 }
 0x53d   : > { %3469 = vpow2.f32 %v1599_v41  ;;  %3187 = vmatmul.mubr.bf16.gmra.mxu1 %v1646_v57 }
 0x53e   : > { %3201 = vmatpush3.bf16.xpose.msra.mxu1 %v1887_v52 }
 0x53f   : > { %3328 = vmatprep.subr.msk.bf16.mxu1 %vm485_vm1, %v4481_v43  ;;  %v1881_v43 = vsel %vm485_vm1, %v4483_v46, 0 }
 0x541   : > { %v4531_v58 = vpop.eup %3463 }
 0x545   : > { %v4535_v59 = vpop.eup %3465 }
 0x546   : > { %3203 = vmatpush3.bf16.xpose.msra.mxu1 %v1884_v1 }
 0x547   : > { %3329 = vmatprep.subr.msk.bf16.mxu1 %vm485_vm1, %v4483_v46 }
 0x549   : > { %v4537_v61 = vpop.eup %3467 }
 0x54a   : > { %v4539_v29 = vpop.eup %3469  ;;  %v1647_v20 = vpack.c.bf16 %v4537_v61, %v4531_v58 }
 0x54b   : > { %v1648_v34 = vpack.c.bf16 %v4535_v59, %v4539_v29 }
 0x54c   : > { %3190 = vmatprep.mubr.bf16.mxu1 %v1647_v20 }
 0x54d   : > { %3191 = vmatmul.mubr.bf16.gmra.mxu1 %v1648_v34 }
 0x54e   : > { %3205 = vmatpush3.bf16.xpose.msra.mxu1 %v1881_v43 }
 0x54f   : > { %3330 = vmatprep.subr.msk.bf16.mxu1 %vm485_vm1, %v1835_v0 }
 0x556   : > { %3207 = vmatpush3.bf16.xpose.msra.mxu1 %v1878_v28 }
 0x557   : > { %3331 = vmatprep.subr.msk.bf16.mxu1 %vm485_vm1, %v1833_v63 }
 0x55a   : > { %v1560_v40 = vpop.xlane.xlu0 %1559 }
 0x55b   : > { %v1577_v41 = vsub.f32 %v4432_v50, %v1560_v40 }
 0x55d   : > { %v1607_v20 = vmul.f32 1.442695, %v1577_v41 }
 0x55e   : > { %3209 = vmatpush3.bf16.xpose.msra.mxu1 %v1875_v13  ;;  %v1556_v31 = vpop.xlane.xlu0 %1555 }
 0x55f   : > { %v1575_v45 = vsub.f32 %v4436_v36, %v1556_v31 }
 0x561   : > { %v1603_v55 = vmul.f32 1.442695, %v1575_v45 }
 0x562   : > { %v1562_v4 = vpop.xlane.xlu0 %1561 }
 0x563   : > { %v1578_v47 = vsub.f32 %v4440_v48, %v1562_v4  ;;  %3471 = vpow2.f32 %v1603_v55 }
 0x565   : > { %v1609_v57 = vmul.f32 1.442695, %v1578_v47 }
 0x566   : > { %v1831_v54 = vpop.permute.xlu0 %1830 }
 0x567   : > { %3332 = vmatprep.subr.msk.bf16.mxu1 %vm485_vm1, %v1831_v54  ;;  %v1872_v46 = vsel %vm485_vm1, %v1831_v54, 0  ;;  %3473 = vpow2.f32 %v1609_v57 }
 0x568   : > { %3211 = vmatpush3.bf16.xpose.msra.mxu1 %v1872_v46 }
 0x56a   : > { %v1813_v34 = vpop.permute.xlu0 %1812 }
 0x56c   : > { %v1558_v52 = vpop.xlane.xlu1 %1557 }
 0x56d   : > { %v1576_v1 = vsub.f32 %v4444_v10, %v1558_v52 }
 0x56e   : > { %v1817_v48 = vpop.permute.xlu0 %1816 }
 0x56f   : > { %v1605_v43 = vmul.f32 1.442695, %v1576_v1 }
 0x570   : > { %v1829_v36 = vpop.permute.xlu1 %1828  ;;  %v4559_v40 = vpop.eup %3471 }
 0x571   : > { %3475 = vpow2.f32 %v1605_v43  ;;  %3333 = vmatprep.subr.msk.bf16.mxu1 %vm485_vm1, %v1829_v36  ;;  %v1869_v0 = vsel %vm485_vm1, %v1829_v36, 0 }
 0x572   : > { %3477 = vpow2.f32 %v1607_v20  ;;  %3213 = vmatpush3.bf16.xpose.msra.mxu1 %v1869_v0  ;;  %v1821_v63 = vpop.permute.xlu0 %1820 }
 0x574   : > { %v1815_v50 = vpop.permute.xlu1 %1814  ;;  %v4561_v13 = vpop.eup %3473 }
 0x576   : > { %v1825_v45 = vpop.permute.xlu0 %1824 }
 0x578   : > { %v1819_v28 = vpop.permute.xlu1 %1818 }
 0x57a   : > { %v2122_v55 = vpop.permute.xlu0 %2121 }
 0x57c   : > { %v1823_v10 = vpop.permute.xlu1 %1822 }
 0x57e   : > { %v4563_v31 = vpop.eup %3475  ;;  %v2118_v52 = vpop.permute.xlu0 %2117 }
 0x57f   : > { %v4565_v4 = vpop.eup %3477  ;;  %v1649_v54 = vpack.c.bf16 %v4563_v31, %v4559_v40 }
 0x580   : > { %v1827_v46 = vpop.permute.xlu1 %1826  ;;  %v1650_v47 = vpack.c.bf16 %v4561_v13, %v4565_v4 }
 0x581   : > { %3194 = vmatprep.mubr.bf16.mxu1 %v1649_v54 }
 0x582   : > { %3195 = vmatmul.mubr.bf16.gmra.mxu1 %v1650_v47  ;;  %v2114_v20 = vpop.permute.xlu0 %2113 }
 0x583   : > { %3214 = vmatprep.mubr.msk.bf16.mxu1 %vm485_vm1, %v1813_v34 }
 0x584   : > { %v2124_v41 = vpop.permute.xlu1 %2123 }
 0x585   : > { %3230 = vmatprep.subr.bf16.mxu0 %v2124_v41  ;;  %3286 = vmatprep.subr.bf16.mxu1 %v2124_v41 }
 0x586   : > { %3231 = vmatpush3.bf16.msra.mxu0 %v2124_v41 }
 0x587   : > { %3232 = vmatprep.subr.bf16.mxu0 %v2122_v55 }
 0x588   : > { %v2120_v57 = vpop.permute.xlu1 %2119 }
 0x58a   : > { %3215 = vmatmul.mubr.msk.bf16.vlgmr.msra.gmra.mxu1 %vm485_vm1, %v1815_v50  ;;  %3233 = vmatpush3.bf16.msra.mxu0 %v2122_v55 }
 0x58b   : > { %3294 = vmatpush3.bf16.msra.mxu1 %v2124_v41  ;;  %3218 = vmatprep.mubr.msk.bf16.mxu1 %vm485_vm1, %v1817_v48 }
 0x58c   : > { %3287 = vmatprep.subr.bf16.mxu1 %v2122_v55  ;;  %3234 = vmatprep.subr.bf16.mxu0 %v2120_v57  ;;  %v2116_v1 = vpop.permute.xlu1 %2115 }
 0x58e   : > { %3235 = vmatpush3.bf16.msra.mxu0 %v2120_v57 }
 0x58f   : > { %3295 = vmatpush3.bf16.msra.mxu1 %v2122_v55  ;;  %3236 = vmatprep.subr.bf16.mxu0 %v2118_v52 }
 0x590   : > { %3288 = vmatprep.subr.bf16.mxu1 %v2120_v57 }
 0x592   : > { %3219 = vmatmul.mubr.msk.bf16.gmra.mxu1 %vm485_vm1, %v1819_v28  ;;  %3237 = vmatpush3.bf16.msra.mxu0 %v2118_v52 }
 0x593   : > { %3296 = vmatpush3.bf16.msra.mxu1 %v2120_v57  ;;  %3222 = vmatprep.mubr.msk.bf16.mxu1 %vm485_vm1, %v1821_v63 }
 0x594   : > { %3289 = vmatprep.subr.bf16.mxu1 %v2118_v52  ;;  %3238 = vmatprep.subr.bf16.mxu0 %v2116_v1 }
 0x596   : > { %3239 = vmatpush3.bf16.msra.mxu0 %v2116_v1 }
 0x597   : > { %3297 = vmatpush3.bf16.msra.mxu1 %v2118_v52  ;;  %3240 = vmatprep.subr.bf16.mxu0 %v2114_v20 }
 0x598   : > { %3290 = vmatprep.subr.bf16.mxu1 %v2116_v1 }
 0x59a   : > { %3223 = vmatmul.mubr.msk.bf16.gmra.mxu1 %vm485_vm1, %v1823_v10  ;;  %3241 = vmatpush3.bf16.msra.mxu0 %v2114_v20 }
 0x59b   : > { %3298 = vmatpush3.bf16.msra.mxu1 %v2116_v1  ;;  %3226 = vmatprep.mubr.msk.bf16.mxu1 %vm485_vm1, %v1825_v45 }
 0x59c   : > { %3291 = vmatprep.subr.bf16.mxu1 %v2114_v20 }
 0x59f   : > { %3299 = vmatpush3.bf16.msra.mxu1 %v2114_v20 }
 0x5a2   : > { %3227 = vmatmul.mubr.msk.bf16.gmra.mxu1 %vm485_vm1, %v1827_v46 }
 0x5f5   : > { %v4579_v34 = vpop.f32.mrf.mxu1 }
 0x5f6   : > { %5066 = vst [vmem:[#allocation42_spill] sm:$0xff] %v4579_v34 }
 0x5f7   : > { %v4581_v43 = vpop.f32.mrf.mxu1 }
 0x5f8   : > { %5067 = vst [vmem:[#allocation43_spill] sm:$0xff] %v4581_v43 }
 0x5f9   : > { %v4583_v36 = vpop.f32.mrf.mxu1 }
 0x5fa   : > { %5068 = vst [vmem:[#allocation44_spill] sm:$0xff] %v4583_v36 }
 0x5fb   : > { %v4585_v0 = vpop.f32.mrf.mxu1 }
 0x5fc   : > { %5069 = vst [vmem:[#allocation45_spill] sm:$0xff] %v4585_v0 }
 0x5fd   : > { %v4587_v48 = vpop.f32.mrf.mxu1 }
 0x5fe   : > { %5070 = vst [vmem:[#allocation46_spill] sm:$0xff] %v4587_v48 }
 0x5ff   : > { %v4589_v50 = vpop.f32.mrf.mxu1 }
 0x600   : > { %5071 = vst [vmem:[#allocation47_spill] sm:$0xff] %v4589_v50 }
 0x601   : > { %v4591_v28 = vpop.f32.mrf.mxu1 }
 0x602   : > { %5072 = vst [vmem:[#allocation48_spill] sm:$0xff] %v4591_v28 }
 0x603   : > { %v4593_v63 = vpop.f32.mrf.mxu1 }
 0x604   : > { %5073 = vst [vmem:[#allocation49_spill] sm:$0xff] %v4593_v63 }
 0x60d   : > { %v4595_v10 = vpop.f32.mrf.mxu1 }
 0x60e   : > { %5074 = vst [vmem:[#allocation50_spill] sm:$0xff] %v4595_v10 }
 0x60f   : > { %v4597_v54 = vpop.f32.mrf.mxu1 }
 0x610   : > { %5075 = vst [vmem:[#allocation51_spill] sm:$0xff] %v4597_v54 }
 0x611   : > { %v4599_v45 = vpop.f32.mrf.mxu1 }
 0x612   : > { %5076 = vst [vmem:[#allocation52_spill] sm:$0xff] %v4599_v45 }
 0x613   : > { %v4601_v46 = vpop.f32.mrf.mxu1 }
 0x614   : > { %5077 = vst [vmem:[#allocation53_spill] sm:$0xff] %v4601_v46 }
 0x642   : > { %v4603_v47 = vpop.f32.mrf.mxu1 }
 0x643   : > { %5078 = vst [vmem:[#allocation54_spill] sm:$0xff] %v4603_v47 }
 0x644   : > { %v4605_v41 = vpop.f32.mrf.mxu1 }
 0x645   : > { %5079 = vst [vmem:[#allocation55_spill] sm:$0xff] %v4605_v41 }
 0x646   : > { %v4607_v55 = vpop.f32.mrf.mxu1 }
 0x647   : > { %5080 = vst [vmem:[#allocation56_spill] sm:$0xff] %v4607_v55 }
 0x648   : > { %v4609_v57 = vpop.f32.mrf.mxu1 }
 0x649   : > { %5081 = vst [vmem:[#allocation57_spill] sm:$0xff] %v4609_v57 }
 0x64a   : > { %v3216_v52 = vpop.f32.mrf.mxu1 }
 0x64b   : > { %v4612_v1 = vadd.f32 %v3216_v52, %v3948_v3 }
 0x64c   : > { %v1926_v20 = vpop.f32.mrf.mxu1 }
 0x64d   : > { %1993 = vmax.xlane.f32.xlu0 %v4612_v1  ;;  %v4616_v10 = vadd.f32 %v1926_v20, %v3948_v3 }
 0x64e   : > { %v3217_v54 = vpop.f32.mrf.mxu1 }
 0x64f   : > { %v4623_v57 = vadd.f32 %v3217_v54, %v3948_v3 }
 0x650   : > { %v1929_v46 = vpop.f32.mrf.mxu1 }
 0x651   : > { %v4619_v47 = vadd.f32 %v1929_v46, %v3948_v3  ;;  %1989 = vmax.xlane.f32.xlu0 %v4616_v10 }
 0x652   : > { %v3220_v41 = vpop.f32.mrf.mxu1 }
 0x653   : > { %1991 = vmax.xlane.f32.xlu1 %v4619_v47  ;;  %v4627_v55 = vadd.f32 %v3220_v41, %v3948_v3 }
 0x654   : > { %v1942_v52 = vpop.f32.mrf.mxu1 }
 0x655   : > { %1995 = vmax.xlane.f32.xlu0 %v4623_v57  ;;  %v4635_v28 = vadd.f32 %v1942_v52, %v3948_v3 }
 0x656   : > { %v3221_v20 = vpop.f32.mrf.mxu1 }
 0x657   : > { %v4631_v45 = vadd.f32 %v3221_v20, %v3948_v3  ;;  %2001 = vmax.xlane.f32.xlu1 %v4627_v55 }
 0x658   : > { %v1945_v46 = vpop.f32.mrf.mxu1 }
 0x659   : > { %2003 = vmax.xlane.f32.xlu0 %v4631_v45  ;;  %v4639_v48 = vadd.f32 %v1945_v46, %v3948_v3 }
 0x65a   : > { %v3224_v54 = vpop.f32.mrf.mxu1 }
 0x65b   : > { %1997 = vmax.xlane.f32.xlu1 %v4635_v28  ;;  %v4643_v63 = vadd.f32 %v3224_v54, %v3948_v3 }
 0x65c   : > { %v1958_v41 = vpop.f32.mrf.mxu1 }
 0x65d   : > { %1999 = vmax.xlane.f32.xlu0 %v4639_v48  ;;  %v4651_v36 = vadd.f32 %v1958_v41, %v3948_v3 }
 0x65e   : > { %v3225_v20 = vpop.f32.mrf.mxu1 }
 0x65f   : > { %v4647_v50 = vadd.f32 %v3225_v20, %v3948_v3  ;;  %2009 = vmax.xlane.f32.xlu1 %v4643_v63 }
 0x660   : > { %v1961_v52 = vpop.f32.mrf.mxu1 }
 0x661   : > { %2011 = vmax.xlane.f32.xlu0 %v4647_v50  ;;  %v4655_v34 = vadd.f32 %v1961_v52, %v3948_v3 }
 0x662   : > { %v3228_v46 = vpop.f32.mrf.mxu1 }
 0x663   : > { %2005 = vmax.xlane.f32.xlu1 %v4651_v36  ;;  %v4659_v0 = vadd.f32 %v3228_v46, %v3948_v3 }
 0x664   : > { %v1974_v54 = vpop.f32.mrf.mxu1 }
 0x665   : > { %2007 = vmax.xlane.f32.xlu0 %v4655_v34  ;;  %v4667_v32 = vadd.f32 %v1974_v54, %v3948_v3 }
 0x666   : > { %v3229_v20 = vpop.f32.mrf.mxu1 }
 0x667   : > { %v4663_v43 = vadd.f32 %v3229_v20, %v3948_v3  ;;  %2017 = vmax.xlane.f32.xlu1 %v4659_v0 }
 0x668   : > { %v1977_v41 = vpop.f32.mrf.mxu1 }
 0x669   : > { %2019 = vmax.xlane.f32.xlu0 %v4663_v43  ;;  %v4671_v52 = vadd.f32 %v1977_v41, %v3948_v3 }
 0x66b   : > { %2013 = vmax.xlane.f32.xlu1 %v4667_v32 }
 0x66d   : > { %2015 = vmax.xlane.f32.xlu0 %v4671_v52 }
 0x67c   : > { %2111 = vrot.lane.b32.xlu1 %v3743_v27, %s3655_s19 }
 0x683   : > { %2109 = vrot.lane.b32.xlu0 %v3739_v22, %s3655_s19 }
 0x6a0   : > { %1145 = vadd.xlane.f32.xlu1 %v4225_v51 }
 0x6a2   : > { %1147 = vadd.xlane.f32.xlu0 %v4230_v9 }
 0x6a4   : > { %1149 = vadd.xlane.f32.xlu1 %v4232_v12 }
 0x6a6   : > { %1151 = vadd.xlane.f32.xlu0 %v4227_v30 }
 0x6a8   : > { %1611 = vadd.xlane.f32.xlu1 %v4493_v16 }
 0x6aa   : > { %1613 = vadd.xlane.f32.xlu0 %v4497_v60 }
 0x6ac   : > { %1615 = vadd.xlane.f32.xlu1 %v4499_v62 }
 0x6ae   : > { %1617 = vadd.xlane.f32.xlu0 %v4495_v26 }
 0x6b0   : > { %1153 = vadd.xlane.f32.xlu1 %v4243_v18 }
 0x6b2   : > { %1155 = vadd.xlane.f32.xlu0 %v4249_v25 }
 0x6b4   : > { %1157 = vadd.xlane.f32.xlu1 %v4251_v2 }
 0x6b6   : > { %1159 = vadd.xlane.f32.xlu0 %v4247_v21 }
 0x6b8   : > { %1619 = vadd.xlane.f32.xlu1 %v4510_v24 }
 0x6ba   : > { %1621 = vadd.xlane.f32.xlu0 %v4512_v56 }
 0x6bc   : > { %1623 = vadd.xlane.f32.xlu1 %v4516_v6 }
 0x6be   : > { %1625 = vadd.xlane.f32.xlu0 %v4521_v49 }
 0x6c0   : > { %1161 = vadd.xlane.f32.xlu1 %v4261_v38 }
 0x6c2   : > { %1163 = vadd.xlane.f32.xlu0 %v4267_v39 }
 0x6c4   : > { %1165 = vadd.xlane.f32.xlu1 %v4271_v35 }
 0x6c6   : > { %1167 = vadd.xlane.f32.xlu0 %v4265_v19 }
 0x6c8   : > { %1627 = vadd.xlane.f32.xlu1 %v4531_v58 }
 0x6ca   : > { %1629 = vadd.xlane.f32.xlu0 %v4537_v61 }
 0x6cc   : > { %1631 = vadd.xlane.f32.xlu1 %v4539_v29 }
 0x6ce   : > { %1633 = vadd.xlane.f32.xlu0 %v4535_v59 }
 0x6d0   : > { %1169 = vadd.xlane.f32.xlu1 %v4291_v7 }
 0x6d2   : > { %1171 = vadd.xlane.f32.xlu0 %v4295_v15 }
 0x6d4   : > { %1173 = vadd.xlane.f32.xlu1 %v4297_v17 }
 0x6d6   : > { %1175 = vadd.xlane.f32.xlu0 %v4293_v11  ;;  %v1994_v22 = vpop.xlane.xlu0 %1993 }
 0x6d7   : > { %v2023_v27 = vsub.f32 %v4612_v1, %v1994_v22 }
 0x6d8   : > { %1635 = vadd.xlane.f32.xlu1 %v4559_v40 }
 0x6d9   : > { %v2041_v18 = vmul.f32 1.442695, %v2023_v27 }
 0x6da   : > { %1637 = vadd.xlane.f32.xlu0 %v4563_v31  ;;  %v1990_v3 = vpop.xlane.xlu0 %1989 }
 0x6db   : > { %v2021_v51 = vsub.f32 %v4616_v10, %v1990_v3 }
 0x6dc   : > { %v1992_v30 = vpop.xlane.xlu1 %1991  ;;  %1639 = vadd.xlane.f32.xlu1 %v4565_v4 }
 0x6dd   : > { %v2037_v9 = vmul.f32 1.442695, %v2021_v51  ;;  %v2022_v12 = vsub.f32 %v4619_v47, %v1992_v30 }
 0x6de   : > { %1641 = vadd.xlane.f32.xlu0 %v4561_v13  ;;  %v1996_v21 = vpop.xlane.xlu0 %1995 }
 0x6df   : > { %v2039_v25 = vmul.f32 1.442695, %v2022_v12  ;;  %v2024_v2 = vsub.f32 %v4623_v57, %v1996_v21  ;;  %3479 = vpow2.f32 %v2037_v9 }
 0x6e0   : > { %v2002_v38 = vpop.xlane.xlu1 %2001  ;;  %711 = vadd.xlane.f32.xlu1 %v4101_v37 }
 0x6e1   : > { %3481 = vpow2.f32 %v2039_v25  ;;  %v2043_v19 = vmul.f32 1.442695, %v2024_v2  ;;  %v2027_v39 = vsub.f32 %v4627_v55, %v2002_v38 }
 0x6e2   : > { %3483 = vpow2.f32 %v2041_v18  ;;  %713 = vadd.xlane.f32.xlu0 %v4105_v8  ;;  %v2004_v35 = vpop.xlane.xlu0 %2003 }
 0x6e3   : > { %3485 = vpow2.f32 %v2043_v19  ;;  %v2028_v7 = vsub.f32 %v4631_v45, %v2004_v35  ;;  %v2049_v15 = vmul.f32 1.442695, %v2027_v39  ;;  %v5082_v19 = vld [vmem:[#allocation14_spill] sm:$0xff]  ;;  %v5083_v39 = vld [vmem:[#allocation13_spill] sm:$0xff]  ;;  %v5084_v35 = vld [vmem:[#allocation16_spill] sm:$0xff] }
 0x6e4   : > { %v1998_v11 = vpop.xlane.xlu1 %1997  ;;  %715 = vadd.xlane.f32.xlu1 %v4107_v53 }
 0x6e5   : > { %v2025_v17 = vsub.f32 %v4635_v28, %v1998_v11  ;;  %v2051_v16 = vmul.f32 1.442695, %v2028_v7  ;;  %3487 = vpow2.f32 %v2049_v15  ;;  %v5085_v7 = vld [vmem:[#allocation12_spill] sm:$0xff]  ;;  %v5086_v11 = vld [vmem:[#allocation18_spill] sm:$0xff]  ;;  %v5087_v15 = vld [vmem:[#allocation17_spill] sm:$0xff] }
 0x6e6   : > { %717 = vadd.xlane.f32.xlu0 %v4112_v44  ;;  %v2000_v37 = vpop.xlane.xlu0 %1999 }
 0x6e7   : > { %v2026_v26 = vsub.f32 %v4639_v48, %v2000_v37  ;;  %v2045_v8 = vmul.f32 1.442695, %v2025_v17  ;;  %3489 = vpow2.f32 %v2051_v16  ;;  %v5088_v17 = vld [vmem:[#allocation15_spill] sm:$0xff] }
 0x6e8   : > { %v2010_v60 = vpop.xlane.xlu1 %2009  ;;  %719 = vadd.xlane.f32.xlu1 %v4131_v33 }
 0x6e9   : > { %v2031_v62 = vsub.f32 %v4643_v63, %v2010_v60  ;;  %v2047_v53 = vmul.f32 1.442695, %v2026_v26  ;;  %3491 = vpow2.f32 %v2045_v8 }
 0x6ea   : > { %721 = vadd.xlane.f32.xlu0 %v4134_v14  ;;  %v2012_v24 = vpop.xlane.xlu0 %2011 }
 0x6eb   : > { %v2032_v56 = vsub.f32 %v4647_v50, %v2012_v24  ;;  %v2057_v58 = vmul.f32 1.442695, %v2031_v62  ;;  %3493 = vpow2.f32 %v2047_v53 }
 0x6ec   : > { %v2006_v6 = vpop.xlane.xlu1 %2005  ;;  %723 = vadd.xlane.f32.xlu1 %v4144_v5  ;;  %v3480_v44 = vpop.eup %3479 }
 0x6ed   : > { %v2029_v33 = vsub.f32 %v4651_v36, %v2006_v6  ;;  %v2059_v13 = vmul.f32 1.442695, %v2032_v56  ;;  %3495 = vpow2.f32 %v2057_v58  ;;  %v5089_v6 = vld [vmem:[#allocation27_spill] sm:$0xff] }
 0x6ee   : > { %v3482_v49 = vpop.eup %3481  ;;  %v2008_v59 = vpop.xlane.xlu0 %2007 }
 0x6ef   : > { %v3484_v61 = vpop.eup %3483  ;;  %v2030_v29 = vsub.f32 %v4655_v34, %v2008_v59  ;;  %v2101_v40 = vpack.c.bf16 %v3482_v49, %v3480_v44  ;;  %v2053_v5 = vmul.f32 1.442695, %v2029_v33  ;;  %3497 = vpow2.f32 %v2059_v13 }
 0x6f0   : > { %v3486_v14 = vpop.eup %3485  ;;  %v2018_v31 = vpop.xlane.xlu1 %2017  ;;  %2073 = vadd.xlane.f32.xlu1 %v3484_v61 }
 0x6f1   : > { %v2035_v4 = vsub.f32 %v4659_v0, %v2018_v31  ;;  %3246 = vmatprep.mubr.bf16.mxu0 %v2101_v40  ;;  %2075 = vadd.xlane.f32.xlu0 %v3486_v14  ;;  %v2055_v50 = vmul.f32 1.442695, %v2030_v29  ;;  %3499 = vpow2.f32 %v2053_v5  ;;  %v2102_v41 = vpack.c.bf16 %v3486_v14, %v3484_v61  ;;  %v5091_v14 = vld [vmem:[#allocation26_spill] sm:$0xff]  ;;  %v5092_v31 = vld [vmem:[#allocation28_spill] sm:$0xff] }
 0x6f2   : > { %v2020_v48 = vpop.xlane.xlu0 %2019  ;;  %v3488_v47 = vpop.eup %3487 }
 0x6f3   : > { %v2036_v36 = vsub.f32 %v4663_v43, %v2020_v48  ;;  %v2065_v28 = vmul.f32 1.442695, %v2035_v4  ;;  %3501 = vpow2.f32 %v2055_v50 }
 0x6f4   : > { %v2014_v63 = vpop.xlane.xlu1 %2013  ;;  %2069 = vadd.xlane.f32.xlu1 %v3480_v44  ;;  %v3490_v1 = vpop.eup %3489 }
 0x6f5   : > { %v2067_v34 = vmul.f32 1.442695, %v2036_v36  ;;  %v2033_v10 = vsub.f32 %v4667_v32, %v2014_v63  ;;  %2071 = vadd.xlane.f32.xlu0 %v3482_v49  ;;  %3503 = vpow2.f32 %v2065_v28  ;;  %v2104_v12 = vpack.c.bf16 %v3490_v1, %v3488_v47  ;;  %v5090_v49 = vld [vmem:[#allocation29_spill] sm:$0xff]  ;;  %v5093_v63 = vld [vmem:[#allocation43_spill] sm:$0xff] }
 0x6f6   : > { %v2016_v45 = vpop.xlane.xlu0 %2015  ;;  %v3492_v46 = vpop.eup %3491 }
 0x6f7   : > { %v2061_v0 = vmul.f32 1.442695, %v2033_v10  ;;  %v2034_v55 = vsub.f32 %v4671_v52, %v2016_v45  ;;  %3505 = vpow2.f32 %v2067_v34  ;;  %v5094_v10 = vld [vmem:[#allocation45_spill] sm:$0xff] }
 0x6f8   : > { %v2112_v57 = vpop.permute.xlu1 %2111  ;;  %2081 = vadd.xlane.f32.xlu1 %v3488_v47  ;;  %v3494_v54 = vpop.eup %3493 }
 0x6f9   : > { %v2063_v43 = vmul.f32 1.442695, %v2034_v55  ;;  %3242 = vmatprep.subr.bf16.mxu0 %v2112_v57  ;;  %3292 = vmatprep.subr.bf16.mxu1 %v2112_v57  ;;  %3507 = vpow2.f32 %v2061_v0  ;;  %v2103_v52 = vpack.c.bf16 %v3494_v54, %v3492_v46 }
 0x6fa   : > { %2083 = vadd.xlane.f32.xlu0 %v3490_v1  ;;  %3243 = vmatpush3.bf16.msra.mxu0 %v2112_v57  ;;  %v2110_v32 = vpop.permute.xlu0 %2109  ;;  %v3496_v20 = vpop.eup %3495 }
 0x6fb   : > { %3509 = vpow2.f32 %v2063_v43  ;;  %3300 = vmatpush3.bf16.msra.mxu1 %v2112_v57  ;;  %3244 = vmatprep.subr.bf16.mxu0 %v2110_v32  ;;  %v5095_v43 = vld [vmem:[#allocation42_spill] sm:$0xff] }
 0x6fc   : > { %3293 = vmatprep.subr.bf16.mxu1 %v2110_v32  ;;  %2077 = vadd.xlane.f32.xlu1 %v3492_v46  ;;  %v3498_v22 = vpop.eup %3497  ;;  %v5096_v46 = vld [vmem:[#allocation44_spill] sm:$0xff] }
 0x6fd   : > { %v2106_v38 = vpack.c.bf16 %v3498_v22, %v3496_v20 }
 0x6fe   : > { %2079 = vadd.xlane.f32.xlu0 %v3494_v54  ;;  %3245 = vmatpush3.bf16.msra.mxu0 %v2110_v32  ;;  %v3500_v27 = vpop.eup %3499 }
 0x6ff   : > { %3301 = vmatpush3.bf16.msra.mxu1 %v2110_v32 }
 0x700   : > { %2089 = vadd.xlane.f32.xlu1 %v3496_v20  ;;  %v3502_v3 = vpop.eup %3501 }
 0x701   : > { %3247 = vmatmul.mubr.bf16.vlgmr.msra.gmra.mxu0 %v2102_v41  ;;  %v2105_v21 = vpack.c.bf16 %v3502_v3, %v3500_v27 }
 0x702   : > { %2091 = vadd.xlane.f32.xlu0 %v3498_v22  ;;  %3250 = vmatprep.mubr.bf16.mxu0 %v2103_v52  ;;  %v3504_v51 = vpop.eup %3503 }
 0x704   : > { %2085 = vadd.xlane.f32.xlu1 %v3500_v27  ;;  %v3506_v30 = vpop.eup %3505 }
 0x705   : > { %v2108_v2 = vpack.c.bf16 %v3506_v30, %v3504_v51 }
 0x706   : > { %2087 = vadd.xlane.f32.xlu0 %v3502_v3  ;;  %v3508_v9 = vpop.eup %3507  ;;  %v5097_v3 = vld [vmem:[#allocation31_spill] sm:$0xff] }
 0x708   : > { %v3510_v18 = vpop.eup %3509  ;;  %2097 = vadd.xlane.f32.xlu1 %v3504_v51 }
 0x709   : > { %3251 = vmatmul.mubr.bf16.gmra.mxu0 %v2104_v12  ;;  %v2107_v25 = vpack.c.bf16 %v3510_v18, %v3508_v9 }
 0x70a   : > { %2099 = vadd.xlane.f32.xlu0 %v3506_v30  ;;  %3254 = vmatprep.mubr.bf16.mxu0 %v2105_v21  ;;  %v5098_v30 = vld [vmem:[#allocation33_spill] sm:$0xff] }
 0x70b   : > { %3258 = vmatprep.mubr.bf16.mxu1 %v2107_v25 }
 0x70c   : > { %2093 = vadd.xlane.f32.xlu1 %v3508_v9  ;;  %3259 = vmatmul.mubr.bf16.vlgmr.msra.gmra.mxu1 %v2108_v2 }
 0x70e   : > { %2095 = vadd.xlane.f32.xlu0 %v3510_v18 }
 0x710   : > { %727 = vadd.xlane.f32.xlu1 %v4156_v23 }
 0x711   : > { %3255 = vmatmul.mubr.bf16.gmra.mxu0 %v2106_v38  ;;  %v5099_v38 = vld [vmem:[#allocation30_spill] sm:$0xff] }
 0x712   : > { %725 = vadd.xlane.f32.xlu0 %v4129_v42 }
 0x714   : > { %731 = vadd.xlane.f32.xlu1 %v5082_v19 }
 0x716   : > { %729 = vadd.xlane.f32.xlu0 %v5083_v39  ;;  %v5100_v39 = vld [vmem:[#allocation32_spill] sm:$0xff] }
 0x718   : > { %735 = vadd.xlane.f32.xlu1 %v5084_v35 }
 0x71a   : > { %733 = vadd.xlane.f32.xlu0 %v5085_v7 }
 0x71c   : > { %739 = vadd.xlane.f32.xlu1 %v5086_v11 }
 0x71e   : > { %737 = vadd.xlane.f32.xlu0 %v5087_v15 }
 0x722   : > { %741 = vadd.xlane.f32.xlu0 %v5088_v17 }
 0x729   : > { %v1146_v37 = vpop.xlane.xlu1 %1145 }
 0x72a   : > { %3511 = vrcp.f32 %v1146_v37 }
 0x72b   : > { %v1148_v23 = vpop.xlane.xlu0 %1147 }
 0x72c   : > { %3513 = vrcp.f32 %v1148_v23  ;;  %v5101_v23 = vld [vmem:[#allocation47_spill] sm:$0xff] }
 0x72d   : > { %v1150_v16 = vpop.xlane.xlu1 %1149 }
 0x72e   : > { %3515 = vrcp.f32 %v1150_v16 }
 0x72f   : > { %v1152_v42 = vpop.xlane.xlu0 %1151 }
 0x730   : > { %3517 = vrcp.f32 %v1152_v42  ;;  %v5102_v42 = vld [vmem:[#allocation49_spill] sm:$0xff] }
 0x731   : > { %v1612_v26 = vpop.xlane.xlu1 %1611 }
 0x732   : > { %3519 = vrcp.f32 %v1612_v26 }
 0x733   : > { %v1614_v60 = vpop.xlane.xlu0 %1613 }
 0x734   : > { %3521 = vrcp.f32 %v1614_v60 }
 0x735   : > { %v1616_v8 = vpop.xlane.xlu1 %1615 }
 0x736   : > { %3523 = vrcp.f32 %v1616_v8 }
 0x737   : > { %v3512_v62 = vpop.eup %3511  ;;  %v1618_v24 = vpop.xlane.xlu0 %1617 }
 0x738   : > { %3525 = vrcp.f32 %v1618_v24  ;;  %v1330_v44 = vmul.f32 %v3512_v62, %v5089_v6 }
 0x739   : > { %v3514_v53 = vpop.eup %3513  ;;  %v1154_v56 = vpop.xlane.xlu1 %1153 }
 0x73a   : > { %3527 = vrcp.f32 %v1154_v56  ;;  %v1331_v58 = vmul.f32 %v3514_v53, %v5090_v49  ;;  %v5103_v56 = vld [vmem:[#allocation46_spill] sm:$0xff] }
 0x73b   : > { %v3516_v33 = vpop.eup %3515  ;;  %v1156_v59 = vpop.xlane.xlu0 %1155 }
 0x73c   : > { %3529 = vrcp.f32 %v1156_v59  ;;  %v1346_v61 = vpack.c.bf16 %v1331_v58, %v1330_v44  ;;  %v1332_v13 = vmul.f32 %v3516_v33, %v5091_v14  ;;  %v5104_v44 = vld [vmem:[#allocation48_spill] sm:$0xff] }
 0x73d   : > { %v3518_v29 = vpop.eup %3517  ;;  %v1158_v40 = vpop.xlane.xlu1 %1157 }
 0x73e   : > { %3531 = vrcp.f32 %v1158_v40  ;;  %2278 = vrot.lane.b32.xlu1 %v1346_v61, %s3654_s18  ;;  %v1333_v4 = vmul.f32 %v3518_v29, %v5092_v31  ;;  %v5105_v40 = vld [vmem:[#allocation35_spill] sm:$0xff] }
 0x73f   : > { %v3520_v5 = vpop.eup %3519  ;;  %v1160_v48 = vpop.xlane.xlu0 %1159 }
 0x740   : > { %3533 = vrcp.f32 %v1160_v48  ;;  %v1347_v50 = vpack.c.bf16 %v1333_v4, %v1332_v13  ;;  %v1788_v34 = vmul.f32 %v3520_v5, %v5093_v63  ;;  %v5106_v13 = vld [vmem:[#allocation37_spill] sm:$0xff] }
 0x741   : > { %v3522_v36 = vpop.eup %3521  ;;  %v1620_v28 = vpop.xlane.xlu1 %1619 }
 0x742   : > { %3535 = vrcp.f32 %v1620_v28  ;;  %2280 = vrot.lane.b32.xlu0 %v1347_v50, %s3654_s18  ;;  %v1789_v45 = vmul.f32 %v3522_v36, %v5094_v10  ;;  %v5107_v28 = vld [vmem:[#allocation34_spill] sm:$0xff] }
 0x743   : > { %v3524_v47 = vpop.eup %3523  ;;  %v1622_v0 = vpop.xlane.xlu0 %1621 }
 0x744   : > { %3537 = vrcp.f32 %v1622_v0  ;;  %v1804_v55 = vpack.c.bf16 %v1789_v45, %v1788_v34  ;;  %v1790_v32 = vmul.f32 %v3524_v47, %v5095_v43  ;;  %v5108_v34 = vld [vmem:[#allocation36_spill] sm:$0xff] }
 0x745   : > { %v3526_v57 = vpop.eup %3525  ;;  %v1624_v1 = vpop.xlane.xlu1 %1623 }
 0x746   : > { %3539 = vrcp.f32 %v1624_v1  ;;  %2302 = vrot.lane.b32.xlu1 %v1804_v55, %s3651_s14  ;;  %v1791_v54 = vmul.f32 %v3526_v57, %v5096_v46  ;;  %v3371_v57 = vld [vmem:[%s4990_s2 + $0x18] sm:$0xff]   ;;  %v3372_v1 = vld [vmem:[%s4990_s2 + $0x10] sm:$0xff]  }
 0x747   : > { %v3528_v20 = vpop.eup %3527  ;;  %v1626_v41 = vpop.xlane.xlu0 %1625  ;;  %3262 = vmatprep.subr.bf16.mxu0 %v3371_v57 }
 0x748   : > { %3541 = vrcp.f32 %v1626_v41  ;;  %v1805_v52 = vpack.c.bf16 %v1791_v54, %v1790_v32  ;;  %v1334_v51 = vmul.f32 %v3528_v20, %v5097_v3  ;;  %3263 = vmatpush3.bf16.msra.mxu0 %v3371_v57 }
 0x749   : > { %v3530_v22 = vpop.eup %3529  ;;  %v1162_v27 = vpop.xlane.xlu1 %1161  ;;  %3264 = vmatprep.subr.bf16.mxu0 %v3372_v1 }
 0x74a   : > { %3543 = vrcp.f32 %v1162_v27  ;;  %2304 = vrot.lane.b32.xlu1 %v1805_v52, %s3651_s14  ;;  %v1335_v9 = vmul.f32 %v3530_v22, %v5098_v30 }
 0x74b   : > { %v3532_v12 = vpop.eup %3531  ;;  %v1164_v18 = vpop.xlane.xlu0 %1163 }
 0x74c   : > { %3545 = vrcp.f32 %v1164_v18  ;;  %v1348_v21 = vpack.c.bf16 %v1335_v9, %v1334_v51  ;;  %v1336_v19 = vmul.f32 %v3532_v12, %v5099_v38  ;;  %3265 = vmatpush3.bf16.msra.mxu0 %v3372_v1  ;;  %v5109_v51 = vld [vmem:[#allocation6_spill] sm:$0xff]  ;;  %v5110_v9 = vld [vmem:[#allocation7_spill] sm:$0xff] }
 0x74d   : > { %v3534_v25 = vpop.eup %3533  ;;  %v1166_v2 = vpop.xlane.xlu1 %1165 }
 0x74e   : > { %3547 = vrcp.f32 %v1166_v2  ;;  %2282 = vrot.lane.b32.xlu0 %v1348_v21, %s3654_s18  ;;  %v1337_v35 = vmul.f32 %v3534_v25, %v5100_v39  ;;  %v5111_v2 = vld [vmem:[#allocation5_spill] sm:$0xff] }
 0x74f   : > { %v3536_v7 = vpop.eup %3535  ;;  %v1168_v11 = vpop.xlane.xlu0 %1167 }
 0x750   : > { %3549 = vrcp.f32 %v1168_v11  ;;  %v1349_v15 = vpack.c.bf16 %v1337_v35, %v1336_v19  ;;  %v1792_v16 = vmul.f32 %v3536_v7, %v5101_v23  ;;  %v5112_v19 = vld [vmem:[#allocation4_spill] sm:$0xff]  ;;  %v5114_v23 = vld [vmem:[#allocation11_spill] sm:$0xff] }
 0x751   : > { %v3538_v17 = vpop.eup %3537  ;;  %v4760_v37 = vpop.xlane.xlu1 %1627 }
 0x752   : > { %2284 = vrot.lane.b32.xlu1 %v1349_v15, %s3654_s18  ;;  %v1793_v26 = vmul.f32 %v3538_v17, %v5102_v42  ;;  %v5113_v15 = vld [vmem:[#allocation3_spill] sm:$0xff] }
 0x753   : > { %v3540_v60 = vpop.eup %3539  ;;  %v4765_v8 = vpop.xlane.xlu0 %1629 }
 0x754   : > { %v1806_v62 = vpack.c.bf16 %v1793_v26, %v1792_v16  ;;  %v1794_v6 = vmul.f32 %v3540_v60, %v5103_v56 }
 0x755   : > { %v3542_v24 = vpop.eup %3541  ;;  %v4767_v53 = vpop.xlane.xlu1 %1631 }
 0x756   : > { %2306 = vrot.lane.b32.xlu0 %v1806_v62, %s3651_s14  ;;  %v1795_v49 = vmul.f32 %v3542_v24, %v5104_v44 }
 0x757   : > { %v3544_v58 = vpop.eup %3543  ;;  %v4772_v33 = vpop.xlane.xlu0 %1633 }
 0x758   : > { %v1807_v59 = vpack.c.bf16 %v1795_v49, %v1794_v6  ;;  %v1338_v14 = vmul.f32 %v3544_v58, %v5105_v40 }
 0x759   : > { %v3546_v61 = vpop.eup %3545  ;;  %v4774_v29 = vpop.xlane.xlu1 %1169 }
 0x75a   : > { %2308 = vrot.lane.b32.xlu1 %v1807_v59, %s3651_s14  ;;  %v1339_v31 = vmul.f32 %v3546_v61, %v5106_v13 }
 0x75b   : > { %v3548_v4 = vpop.eup %3547  ;;  %v4779_v5 = vpop.xlane.xlu0 %1171 }
 0x75c   : > { %v1350_v48 = vpack.c.bf16 %v1339_v31, %v1338_v14  ;;  %v1340_v63 = vmul.f32 %v3548_v4, %v5107_v28 }
 0x75d   : > { %v3550_v50 = vpop.eup %3549  ;;  %v4781_v36 = vpop.xlane.xlu1 %1173 }
 0x75e   : > { %2286 = vrot.lane.b32.xlu0 %v1350_v48, %s3654_s18  ;;  %v1341_v10 = vmul.f32 %v3550_v50, %v5108_v34 }
 0x75f   : > { %v1176_v45 = vpop.xlane.xlu0 %1175 }
 0x760   : > { %v1351_v47 = vpack.c.bf16 %v1341_v10, %v1340_v63 }
 0x761   : > { %v4786_v0 = vpop.xlane.xlu1 %1635 }
 0x762   : > { %2288 = vrot.lane.b32.xlu1 %v1351_v47, %s3654_s18  ;;  %v3374_v47 = vld [vmem:[%s4990_s2] sm:$0xff]  }
 0x763   : > { %v4789_v55 = vpop.xlane.xlu0 %1637 }
 0x765   : > { %v4797_v43 = vpop.xlane.xlu1 %1639 }
 0x767   : > { %v4799_v32 = vpop.xlane.xlu0 %1641 }
 0x769   : > { %v712_v46 = vpop.xlane.xlu1 %711 }
 0x76a   : > { %3551 = vrcp.f32 %v712_v46 }
 0x76b   : > { %v714_v54 = vpop.xlane.xlu0 %713 }
 0x76c   : > { %3553 = vrcp.f32 %v714_v54 }
 0x76d   : > { %v716_v20 = vpop.xlane.xlu1 %715 }
 0x76e   : > { %3555 = vrcp.f32 %v716_v20 }
 0x76f   : > { %v718_v41 = vpop.xlane.xlu0 %717 }
 0x770   : > { %3557 = vrcp.f32 %v718_v41 }
 0x771   : > { %v720_v52 = vpop.xlane.xlu1 %719 }
 0x772   : > { %3559 = vrcp.f32 %v720_v52  ;;  %v5116_v52 = vld [vmem:[#allocation50_spill] sm:$0xff] }
 0x773   : > { %v722_v22 = vpop.xlane.xlu0 %721 }
 0x774   : > { %3561 = vrcp.f32 %v722_v22 }
 0x775   : > { %v4825_v26 = vpop.xlane.xlu1 %723  ;;  %3563 = vrcp.f32 %v4765_v8 }
 0x776   : > { %3565 = vrcp.f32 %v4767_v53 }
 0x777   : > { %v3552_v27 = vpop.eup %3551  ;;  %3567 = vrcp.f32 %v4772_v33 }
 0x778   : > { %v4802_v30 = vmul.f32 %v3552_v27, %v5109_v51  ;;  %v5117_v27 = vld [vmem:[#allocation53_spill] sm:$0xff] }
 0x779   : > { %v3554_v3 = vpop.eup %3553  ;;  %v2074_v62 = vpop.xlane.xlu1 %2073 }
 0x77a   : > { %v4805_v12 = vmul.f32 %v3554_v3, %v5110_v9  ;;  %v2076_v60 = vpop.xlane.xlu0 %2075  ;;  %3569 = vrcp.f32 %v2074_v62 }
 0x77b   : > { %v3556_v18 = vpop.eup %3555  ;;  %3571 = vrcp.f32 %v2076_v60 }
 0x77c   : > { %v880_v21 = vpack.c.bf16 %v4805_v12, %v4802_v30  ;;  %v4810_v38 = vmul.f32 %v3556_v18, %v5111_v2  ;;  %v5118_v2 = vld [vmem:[#allocation51_spill] sm:$0xff] }
 0x77d   : > { %v3558_v25 = vpop.eup %3557  ;;  %v2070_v56 = vpop.xlane.xlu1 %2069 }
 0x77e   : > { %v4813_v39 = vmul.f32 %v3558_v25, %v5112_v19  ;;  %v2072_v24 = vpop.xlane.xlu0 %2071  ;;  %3573 = vrcp.f32 %v2070_v56 }
 0x77f   : > { %v3560_v35 = vpop.eup %3559  ;;  %3575 = vrcp.f32 %v2072_v24 }
 0x780   : > { %v881_v7 = vpack.c.bf16 %v4813_v39, %v4810_v38  ;;  %v4818_v17 = vmul.f32 %v3560_v35, %v5113_v15  ;;  %3577 = vrcp.f32 %v4760_v37  ;;  %v3373_v37 = vld [vmem:[%s4990_s2 + $0x8] sm:$0xff]  }
 0x781   : > { %v3562_v11 = vpop.eup %3561  ;;  %v2082_v44 = vpop.xlane.xlu1 %2081  ;;  %3579 = vrcp.f32 %v4779_v5  ;;  %3266 = vmatprep.subr.bf16.mxu0 %v3373_v37 }
 0x782   : > { %v4821_v16 = vmul.f32 %v3562_v11, %v5114_v23  ;;  %3581 = vrcp.f32 %v4781_v36  ;;  %v3564_v8 = vpop.eup %3563  ;;  %3267 = vmatpush3.bf16.msra.mxu0 %v3373_v37 }
 0x783   : > { %v2084_v6 = vpop.xlane.xlu0 %2083  ;;  %3583 = vrcp.f32 %v1176_v45  ;;  %v3566_v40 = vpop.eup %3565  ;;  %3268 = vmatprep.subr.bf16.mxu0 %v3374_v47  ;;  %v1797_v3 = vmul.f32 %v3564_v8, %v5117_v27 }
 0x784   : > { %v882_v42 = vpack.c.bf16 %v4821_v16, %v4818_v17  ;;  %3585 = vrcp.f32 %v2082_v44  ;;  %v3568_v13 = vpop.eup %3567  ;;  %v1798_v22 = vmul.f32 %v3566_v40, %v5116_v52  ;;  %v5123_v52 = vld [vmem:[#allocation56_spill] sm:$0xff] }
 0x785   : > { %v2078_v58 = vpop.xlane.xlu1 %2077  ;;  %3587 = vrcp.f32 %v2084_v6 }
 0x786   : > { %3589 = vrcp.f32 %v2078_v58  ;;  %3269 = vmatpush3.bf16.msra.mxu0 %v3374_v47 }
 0x787   : > { %v2080_v49 = vpop.xlane.xlu0 %2079  ;;  %v3570_v4 = vpop.eup %3569 }
 0x788   : > { %3591 = vrcp.f32 %v2080_v49  ;;  %v3572_v5 = vpop.eup %3571  ;;  %v5119_v49 = vld [vmem:[#allocation40_spill] sm:$0xff] }
 0x789   : > { %v2090_v61 = vpop.xlane.xlu1 %2089  ;;  %3593 = vrcp.f32 %v4774_v29  ;;  %v5115_v29 = vld [vmem:[#allocation52_spill] sm:$0xff] }
 0x78a   : > { %3595 = vrcp.f32 %v4789_v55  ;;  %v1799_v45 = vmul.f32 %v3568_v13, %v5115_v29  ;;  %v5120_v13 = vld [vmem:[#allocation38_spill] sm:$0xff] }
 0x78b   : > { %v2092_v59 = vpop.xlane.xlu0 %2091  ;;  %3597 = vrcp.f32 %v4797_v43  ;;  %v3574_v50 = vpop.eup %3573 }
 0x78c   : > { %3599 = vrcp.f32 %v4799_v32  ;;  %v3576_v63 = vpop.eup %3575  ;;  %v1809_v25 = vpack.c.bf16 %v1799_v45, %v1798_v22 }
 0x78d   : > { %v2086_v14 = vpop.xlane.xlu1 %2085  ;;  %3601 = vrcp.f32 %v2090_v61  ;;  %v3578_v55 = vpop.eup %3577 }
 0x78e   : > { %3603 = vrcp.f32 %v2092_v59  ;;  %v3580_v54 = vpop.eup %3579  ;;  %v1796_v19 = vmul.f32 %v3578_v55, %v5118_v2 }
 0x78f   : > { %v2088_v53 = vpop.xlane.xlu0 %2087  ;;  %3605 = vrcp.f32 %v2086_v14  ;;  %v3582_v20 = vpop.eup %3581 }
 0x790   : > { %3607 = vrcp.f32 %v2088_v53  ;;  %v3584_v51 = vpop.eup %3583  ;;  %v1808_v56 = vpack.c.bf16 %v1797_v3, %v1796_v19 }
 0x791   : > { %v2098_v57 = vpop.xlane.xlu1 %2097  ;;  %v3586_v18 = vpop.eup %3585  ;;  %3609 = vrcp.f32 %v4786_v0  ;;  %v1345_v58 = vmul.f32 %v3584_v51, %v5119_v49  ;;  %v5124_v51 = vld [vmem:[#allocation54_spill] sm:$0xff] }
 0x792   : > { %v3588_v35 = vpop.eup %3587 }
 0x793   : > { %v2100_v34 = vpop.xlane.xlu0 %2099  ;;  %v3590_v23 = vpop.eup %3589 }
 0x794   : > { %3611 = vrcp.f32 %v2100_v34  ;;  %v5122_v34 = vld [vmem:[#allocation39_spill] sm:$0xff] }
 0x795   : > { %v2094_v60 = vpop.xlane.xlu1 %2093  ;;  %v3592_v6 = vpop.eup %3591  ;;  %3613 = vrcp.f32 %v2098_v57 }
 0x796   : > { %v3594_v59 = vpop.eup %3593 }
 0x797   : > { %v2096_v11 = vpop.xlane.xlu0 %2095 }
 0x798   : > { %3615 = vrcp.f32 %v2096_v11 }
 0x799   : > { %3617 = vrcp.f32 %v2094_v60 }
 0x7c1   : > { %v3248_v33 = vpop.f32.mrf.mxu0 }
 0x7c2   : > { %v2248_v36 = vmul.f32 %v3570_v4, %v3248_v33  ;;  %v3596_v33 = vpop.eup %3595  ;;  %v5121_v4 = vld [vmem:[#allocation41_spill] sm:$0xff] }
 0x7c3   : > { %v2167_v31 = vpop.f32.mrf.mxu0  ;;  %v3598_v14 = vpop.eup %3597 }
 0x7c4   : > { %v2246_v1 = vmul.f32 %v3574_v50, %v2167_v31  ;;  %v1344_v31 = vmul.f32 %v3582_v20, %v5120_v13 }
 0x7c5   : > { %v3249_v48 = vpop.f32.mrf.mxu0 }
 0x7c6   : > { %v2249_v28 = vmul.f32 %v3572_v5, %v3249_v48  ;;  %v1343_v5 = vmul.f32 %v3580_v54, %v5121_v4  ;;  %v3600_v48 = vpop.eup %3599 }
 0x7c7   : > { %v2170_v10 = vpop.f32.mrf.mxu0  ;;  %v1803_v22 = vmul.f32 %v3600_v48, %v5123_v52 }
 0x7c8   : > { %v2263_v43 = vpack.c.bf16 %v2249_v28, %v2248_v36  ;;  %v2247_v46 = vmul.f32 %v3576_v63, %v2170_v10  ;;  %v3602_v28 = vpop.eup %3601  ;;  %v1353_v63 = vpack.c.bf16 %v1345_v58, %v1344_v31  ;;  %v1342_v10 = vmul.f32 %v3594_v59, %v5122_v34 }
 0x7c9   : > { %v3252_v32 = vpop.f32.mrf.mxu0  ;;  %v3604_v29 = vpop.eup %3603 }
 0x7ca   : > { %v2262_v41 = vpack.c.bf16 %v2247_v46, %v2246_v1  ;;  %2328 = vrot.lane.b32.xlu1 %v2263_v43, %s3649_s12  ;;  %v2252_v62 = vmul.f32 %v3586_v18, %v3252_v32  ;;  %v3606_v47 = vpop.eup %3605  ;;  %v1352_v1 = vpack.c.bf16 %v1343_v5, %v1342_v10  ;;  %v5125_v18 = vld [vmem:[#allocation57_spill] sm:$0xff] }
 0x7cb   : > { %v2183_v9 = vpop.f32.mrf.mxu0  ;;  %v3608_v43 = vpop.eup %3607 }
 0x7cc   : > { %2326 = vrot.lane.b32.xlu0 %v2262_v41, %s3649_s12  ;;  %v3260_v44 = vpop.f32.mrf.mxu1  ;;  %v2250_v61 = vmul.f32 %v3590_v23, %v2183_v9  ;;  %v3610_v27 = vpop.eup %3609  ;;  %v1802_v9 = vmul.f32 %v3598_v14, %v5124_v51  ;;  %v5126_v23 = vld [vmem:[#allocation55_spill] sm:$0xff] }
 0x7cd   : > { %v3253_v15 = vpop.f32.mrf.mxu0  ;;  %v3612_v2 = vpop.eup %3611  ;;  %v1800_v60 = vmul.f32 %v3610_v27, %v5126_v23 }
 0x7ce   : > { %v2253_v24 = vmul.f32 %v3588_v35, %v3253_v15  ;;  %2312 = vrot.lane.b32.xlu1 %v1809_v25, %s3651_s14  ;;  %v2215_v50 = vpop.f32.mrf.mxu1  ;;  %v1801_v25 = vmul.f32 %v3596_v33, %v5125_v18  ;;  %v3614_v35 = vpop.eup %3613  ;;  %v1811_v15 = vpack.c.bf16 %v1803_v22, %v1802_v9 }
 0x7cf   : > { %v2186_v0 = vpop.f32.mrf.mxu0 }
 0x7d0   : > { %v2265_v8 = vpack.c.bf16 %v2253_v24, %v2252_v62  ;;  %v2251_v53 = vmul.f32 %v3592_v6, %v2186_v0  ;;  %2310 = vrot.lane.b32.xlu0 %v1808_v56, %s3651_s14  ;;  %v3261_v46 = vpop.f32.mrf.mxu1  ;;  %v3616_v62 = vpop.eup %3615  ;;  %v2260_v24 = vmul.f32 %v3614_v35, %v3260_v44  ;;  %v1810_v6 = vpack.c.bf16 %v1801_v25, %v1800_v60 }
 0x7d1   : > { %v3256_v40 = vpop.f32.mrf.mxu0  ;;  %v2261_v11 = vmul.f32 %v3612_v2, %v3261_v46  ;;  %v3618_v0 = vpop.eup %3617 }
 0x7d2   : > { %v2264_v37 = vpack.c.bf16 %v2251_v53, %v2250_v61  ;;  %2332 = vrot.lane.b32.xlu1 %v2265_v8, %s3649_s12  ;;  %v2256_v55 = vmul.f32 %v3602_v28, %v3256_v40  ;;  %v2218_v19 = vpop.f32.mrf.mxu1  ;;  %v2258_v49 = vmul.f32 %v3618_v0, %v2215_v50  ;;  %v728_v61 = vpop.xlane.xlu1 %727  ;;  %v5131_v0 = vld [vmem:[#allocation10_spill] sm:$0xff] }
 0x7d3   : > { %v2199_v36 = vpop.f32.mrf.mxu0  ;;  %v2259_v56 = vmul.f32 %v3616_v62, %v2218_v19  ;;  %v2269_v58 = vpack.c.bf16 %v2261_v11, %v2260_v24  ;;  %v726_v8 = vpop.xlane.xlu0 %725  ;;  %v5129_v19 = vld [vmem:[#allocation20_spill] sm:$0xff] }
 0x7d4   : > { %2330 = vrot.lane.b32.xlu0 %v2264_v37, %s3649_s12  ;;  %v2254_v32 = vmul.f32 %v3606_v47, %v2199_v36  ;;  %3619 = vrcp.f32 %v726_v8 }
 0x7d5   : > { %v3257_v45 = vpop.f32.mrf.mxu0  ;;  %v2268_v59 = vpack.c.bf16 %v2259_v56, %v2258_v49  ;;  %3621 = vrcp.f32 %v4825_v26  ;;  %v5130_v56 = vld [vmem:[#allocation21_spill] sm:$0xff] }
 0x7d6   : > { %v2257_v57 = vmul.f32 %v3604_v29, %v3257_v45  ;;  %2292 = vrot.lane.b32.xlu1 %v1353_v63, %s3654_s18  ;;  %v732_v53 = vpop.xlane.xlu1 %731 }
 0x7d7   : > { %v2202_v54 = vpop.f32.mrf.mxu0  ;;  %v730_v33 = vpop.xlane.xlu0 %729 }
 0x7d8   : > { %v2267_v20 = vpack.c.bf16 %v2257_v57, %v2256_v55  ;;  %v2255_v41 = vmul.f32 %v3608_v43, %v2202_v54  ;;  %2290 = vrot.lane.b32.xlu0 %v1352_v1, %s3654_s18  ;;  %v5127_v1 = vld [vmem:[#allocation9_spill] sm:$0xff] }
 0x7da   : > { %v2266_v3 = vpack.c.bf16 %v2255_v41, %v2254_v32  ;;  %2336 = vrot.lane.b32.xlu1 %v2267_v20, %s3649_s12  ;;  %v736_v40 = vpop.xlane.xlu1 %735  ;;  %v5128_v32 = vld [vmem:[#allocation8_spill] sm:$0xff] }
 0x7db   : > { %v734_v44 = vpop.xlane.xlu0 %733 }
 0x7dc   : > { %2334 = vrot.lane.b32.xlu0 %v2266_v3, %s3649_s12  ;;  %3623 = vrcp.f32 %v734_v44 }
 0x7dd   : > { %3625 = vrcp.f32 %v732_v53 }
 0x7de   : > { %2316 = vrot.lane.b32.xlu1 %v1811_v15, %s3651_s14  ;;  %v740_v14 = vpop.xlane.xlu1 %739  ;;  %3627 = vrcp.f32 %v730_v33 }
 0x7df   : > { %v738_v13 = vpop.xlane.xlu0 %737  ;;  %3629 = vrcp.f32 %v728_v61 }
 0x7e0   : > { %2314 = vrot.lane.b32.xlu0 %v1810_v6, %s3651_s14 }
 0x7e1   : > { %v3620_v10 = vpop.eup %3619 }
 0x7e2   : > { %2340 = vrot.lane.b32.xlu1 %v2269_v58, %s3649_s12  ;;  %v2279_v37 = vpop.permute.xlu1 %2278  ;;  %v3622_v26 = vpop.eup %3621  ;;  %v871_v43 = vmul.f32 %v3620_v10, %v5127_v1 }
 0x7e3   : > { %v742_v4 = vpop.xlane.xlu0 %741  ;;  %v2344_v57 = vsel %vm485_vm1, %v880_v21, %v2279_v37  ;;  %v870_v20 = vmul.f32 %v3622_v26, %v5128_v32 }
 0x7e4   : > { %2338 = vrot.lane.b32.xlu0 %v2268_v59, %s3649_s12  ;;  %3631 = vrcp.f32 %v742_v4  ;;  %v5132_v59 = vld [vmem:[#allocation19_spill] sm:$0xff] }
 0x7e5   : > { %3633 = vrcp.f32 %v740_v14  ;;  %v883_v52 = vpack.c.bf16 %v871_v43, %v870_v20 }
 0x7e6   : > { %v2303_v31 = vpop.permute.xlu1 %2302  ;;  %3635 = vrcp.f32 %v738_v13 }
 0x7e7   : > { %v2281_v48 = vpop.permute.xlu0 %2280  ;;  %v2368_v38 = vsel %vm2366_vm4, %v2344_v57, %v2303_v31  ;;  %3637 = vrcp.f32 %v736_v40  ;;  %v5135_v57 = vld [vmem:[#allocation25_spill] sm:$0xff] }
 0x7e8   : > { %v2347_v45 = vsel %vm485_vm1, %v881_v7, %v2281_v48 }
 0x7e9   : > { %v3624_v22 = vpop.eup %3623 }
 0x7ea   : > { %v2305_v5 = vpop.permute.xlu1 %2304  ;;  %v3626_v3 = vpop.eup %3625  ;;  %v875_v35 = vmul.f32 %v3624_v22, %v5129_v19 }
 0x7eb   : > { %v2283_v36 = vpop.permute.xlu0 %2282  ;;  %v2370_v47 = vsel %vm2366_vm4, %v2347_v45, %v2305_v5  ;;  %v3628_v9 = vpop.eup %3627  ;;  %v874_v49 = vmul.f32 %v3626_v3, %v5131_v0 }
 0x7ec   : > { %v2350_v2 = vsel %vm485_vm1, %v882_v42, %v2283_v36  ;;  %v3630_v15 = vpop.eup %3629  ;;  %v873_v6 = vmul.f32 %v3628_v9, %v5130_v56 }
 0x7ed   : > { %v872_v61 = vmul.f32 %v3630_v15, %v5132_v59  ;;  %v885_v8 = vpack.c.bf16 %v875_v35, %v874_v49 }
 0x7ee   : > { %v2285_v50 = vpop.permute.xlu1 %2284 }
 0x7ef   : > { %v2307_v63 = vpop.permute.xlu0 %2306  ;;  %v2353_v51 = vsel %vm485_vm1, %v883_v52, %v2285_v50  ;;  %v884_v37 = vpack.c.bf16 %v873_v6, %v872_v61  ;;  %v5133_v50 = vld [vmem:[#allocation24_spill] sm:$0xff] }
 0x7f0   : > { %v2372_v23 = vsel %vm2366_vm4, %v2350_v2, %v2307_v63 }
 0x7f1   : > { %v3632_v33 = vpop.eup %3631 }
 0x7f2   : > { %v2309_v28 = vpop.permute.xlu1 %2308  ;;  %v3634_v14 = vpop.eup %3633  ;;  %v879_v36 = vmul.f32 %v3632_v33, %v5133_v50 }
 0x7f3   : > { %v4873_v29 = vpop.permute.xlu0 %2286  ;;  %v2374_v18 = vsel %vm2366_vm4, %v2353_v51, %v2309_v28  ;;  %v3636_v31 = vpop.eup %3635 }
 0x7f4   : > { %v2356_v48 = vsel %vm485_vm1, %v884_v37, %v4873_v29  ;;  %v3638_v63 = vpop.eup %3637  ;;  %v877_v1 = vmul.f32 %v3636_v31, %v5135_v57 }
 0x7f6   : > { %v4871_v34 = vpop.permute.xlu1 %2288 }
 0x7f7   : > { %v2359_v13 = vsel %vm485_vm1, %v885_v8, %v4871_v34 }
 0x83c   : > { %v2329_v55 = vpop.permute.xlu1 %2328 }
 0x83d   : > { %v2387_v46 = vsel %vm2383_vm3, %v2370_v47, %v2329_v55  ;;  %v5134_v47 = vld [vmem:[#allocation22_spill] sm:$0xff] }
 0x83e   : > { %v2827_v39 = vcombine.low %v2387_v46, %v2387_v46  ;;  %v2828_v7 = vcombine.high %v2387_v46, %v2387_v46  ;;  %v2327_v54 = vpop.permute.xlu0 %2326  ;;  %v878_v55 = vmul.f32 %v3634_v14, %v5134_v47 }
 0x83f   : > { %v2385_v41 = vsel %vm2383_vm3, %v2368_v38, %v2327_v54 }
 0x840   : > { %2459 = vst.msk [vmem:[#allocation2 + $0x8] sm:$0xf] %vm2456_vm5, %v2827_v39  ;;  %2460 = vst.msk [vmem:[#allocation2 + $0xc] sm:$0xf] %vm2456_vm5, %v2828_v7  ;;  %v2825_v30 = vcombine.low %v2385_v41, %v2385_v41  ;;  %v2826_v12 = vcombine.high %v2385_v41, %v2385_v41  ;;  %v2313_v21 = vpop.permute.xlu1 %2312  ;;  %v887_v39 = vpack.c.bf16 %v879_v36, %v878_v55  ;;  %v5136_v7 = vld [vmem:[#allocation23_spill] sm:$0xff] }
 0x841   : > { %v2378_v4 = vsel %vm2366_vm4, %v2359_v13, %v2313_v21  ;;  %v876_v54 = vmul.f32 %v3638_v63, %v5136_v7 }
 0x842   : > { %2457 = vst.msk [vmem:[#allocation2] sm:$0xf] %vm2456_vm5, %v2825_v30  ;;  %2458 = vst.msk [vmem:[#allocation2 + $0x4] sm:$0xf] %vm2456_vm5, %v2826_v12  ;;  %v2311_v27 = vpop.permute.xlu0 %2310 }
 0x843   : > { %v2376_v10 = vsel %vm2366_vm4, %v2356_v48, %v2311_v27  ;;  %v886_v12 = vpack.c.bf16 %v877_v1, %v876_v54 }
 0x844   : > { %v2333_v25 = vpop.permute.xlu1 %2332 }
 0x845   : > { %v2391_v11 = vsel %vm2383_vm3, %v2374_v18, %v2333_v25 }
 0x846   : > { %v2831_v60 = vcombine.low %v2391_v11, %v2391_v11  ;;  %v2832_v62 = vcombine.high %v2391_v11, %v2391_v11  ;;  %v2331_v24 = vpop.permute.xlu0 %2330 }
 0x847   : > { %v2389_v58 = vsel %vm2383_vm3, %v2372_v23, %v2331_v24  ;;  %v3376_v44 = vld [vmem:[#allocation2 + $0x8] sm:$0xff]  }
 0x848   : > { %2463 = vst.msk [vmem:[#allocation2 + $0x18] sm:$0xf] %vm2456_vm5, %v2831_v60  ;;  %2464 = vst.msk [vmem:[#allocation2 + $0x1c] sm:$0xf] %vm2456_vm5, %v2832_v62  ;;  %v2829_v17 = vcombine.low %v2389_v58, %v2389_v58  ;;  %v2830_v16 = vcombine.high %v2389_v58, %v2389_v58  ;;  %v2293_v42 = vpop.permute.xlu1 %2292  ;;  %v2841_v60 = vld [vmem:[%s4991_s3] ss:$0 sm:$0xff] }
 0x849   : > { %v3375_v53 = vld [vmem:[#allocation2] sm:$0xff]   ;;  %v2365_v30 = vsel %vm485_vm1, %v887_v39, %v2293_v42 }
 0x84a   : > { %2461 = vst.msk [vmem:[#allocation2 + $0x10] sm:$0xf] %vm2456_vm5, %v2829_v17  ;;  %2462 = vst.msk [vmem:[#allocation2 + $0x14] sm:$0xf] %vm2456_vm5, %v2830_v16  ;;  %v2291_v40 = vpop.permute.xlu0 %2290  ;;  %3270 = vmatprep.mubr.msk.bf16.mxu0 %vm307_vm0, %v3375_v53 }
 0x84b   : > { %3271 = vmatmul.mubr.msk.bf16.vlgmr.msra.gmra.mxu0 %vm307_vm0, %v3376_v44  ;;  %v2362_v22 = vsel %vm485_vm1, %v886_v12, %v2291_v40 }
 0x84c   : > { %v2337_v5 = vpop.permute.xlu1 %2336 }
 0x84d   : > { %v2395_v28 = vsel %vm2383_vm3, %v2378_v4, %v2337_v5 }
 0x84e   : > { %v2835_v45 = vcombine.low %v2395_v28, %v2395_v28  ;;  %v2836_v34 = vcombine.high %v2395_v28, %v2395_v28  ;;  %v2335_v26 = vpop.permute.xlu0 %2334 }
 0x84f   : > { %v2393_v43 = vsel %vm2383_vm3, %v2376_v10, %v2335_v26  ;;  %v3378_v41 = vld [vmem:[#allocation2 + $0x18] sm:$0xff]  }
 0x850   : > { %2467 = vst.msk [vmem:[#allocation2 + $0x28] sm:$0xf] %vm2456_vm5, %v2835_v45  ;;  %2468 = vst.msk [vmem:[#allocation2 + $0x2c] sm:$0xf] %vm2456_vm5, %v2836_v34  ;;  %v2833_v29 = vcombine.low %v2393_v43, %v2393_v43  ;;  %v2834_v46 = vcombine.high %v2393_v43, %v2393_v43  ;;  %v2317_v38 = vpop.permute.xlu1 %2316 }
 0x851   : > { %v3377_v32 = vld [vmem:[#allocation2 + $0x10] sm:$0xff]   ;;  %v2382_v21 = vsel %vm2366_vm4, %v2365_v30, %v2317_v38 }
 0x852   : > { %2465 = vst.msk [vmem:[#allocation2 + $0x20] sm:$0xf] %vm2456_vm5, %v2833_v29  ;;  %2466 = vst.msk [vmem:[#allocation2 + $0x24] sm:$0xf] %vm2456_vm5, %v2834_v46  ;;  %v2315_v20 = vpop.permute.xlu0 %2314  ;;  %3274 = vmatprep.mubr.msk.bf16.mxu0 %vm307_vm0, %v3377_v32 }
 0x853   : > { %3275 = vmatmul.mubr.msk.bf16.gmra.mxu0 %vm307_vm0, %v3378_v41  ;;  %v2380_v3 = vsel %vm2366_vm4, %v2362_v22, %v2315_v20 }
 0x854   : > { %v2341_v52 = vpop.permute.xlu1 %2340 }
 0x855   : > { %v2399_v27 = vsel %vm2383_vm3, %v2382_v21, %v2341_v52 }
 0x856   : > { %v2839_v51 = vcombine.low %v2399_v27, %v2399_v27  ;;  %v2840_v9 = vcombine.high %v2399_v27, %v2399_v27  ;;  %v2339_v18 = vpop.permute.xlu0 %2338 }
 0x857   : > { %v2397_v25 = vsel %vm2383_vm3, %v2380_v3, %v2339_v18  ;;  %v3380_v11 = vld [vmem:[#allocation2 + $0x28] sm:$0xff]  }
 0x858   : > { %2471 = vst.msk [vmem:[#allocation2 + $0x38] sm:$0xf] %vm2456_vm5, %v2839_v51  ;;  %2472 = vst.msk [vmem:[#allocation2 + $0x3c] sm:$0xf] %vm2456_vm5, %v2840_v9  ;;  %v2837_v2 = vcombine.low %v2397_v25, %v2397_v25  ;;  %v2838_v19 = vcombine.high %v2397_v25, %v2397_v25 }
 0x859   : > { %v3379_v35 = vld [vmem:[#allocation2 + $0x20] sm:$0xff]  }
 0x85a   : > { %2469 = vst.msk [vmem:[#allocation2 + $0x30] sm:$0xf] %vm2456_vm5, %v2837_v2  ;;  %2470 = vst.msk [vmem:[#allocation2 + $0x34] sm:$0xf] %vm2456_vm5, %v2838_v19  ;;  %3278 = vmatprep.mubr.msk.bf16.mxu0 %vm307_vm0, %v3379_v35 }
 0x85b   : > { %3279 = vmatmul.mubr.msk.bf16.gmra.mxu0 %vm307_vm0, %v3380_v11 }
 0x85f   : > { %v3382_v23 = vld [vmem:[#allocation2 + $0x38] sm:$0xff]  }
 0x861   : > { %v3381_v15 = vld [vmem:[#allocation2 + $0x30] sm:$0xff]  }
 0x862   : > { %3282 = vmatprep.mubr.msk.bf16.mxu0 %vm307_vm0, %v3381_v15 }
 0x863   : > { %3283 = vmatmul.mubr.msk.bf16.gmra.mxu0 %vm307_vm0, %v3382_v23 }
 0x90b   : > { %v3272_v62 = vpop.f32.mrf.mxu0 }
 0x90c   : > { %v2635_v24 = vadd.f32 %v3272_v62, %v2841_v60 }
 0x90d   : > { %v2626_v56 = vpop.f32.mrf.mxu0 }
 0x90e   : > { %2691 = vst.msk [vmem:[%s4951_s7 + $0x10] sm:$0xff] %vm307_vm0, %v2635_v24  ;;  %v2627_v6 = vadd.f32 %v2841_v60, %v2626_v56 }
 0x90f   : > { %v3273_v0 = vpop.f32.mrf.mxu0 }
 0x910   : > { %2689 = vst.msk [vmem:[%s4951_s7] sm:$0xff] %vm307_vm0, %v2627_v6  ;;  %v2638_v49 = vadd.f32 %v3273_v0, %v2841_v60 }
 0x911   : > { %v2629_v58 = vpop.f32.mrf.mxu0 }
 0x912   : > { %2692 = vst.msk [vmem:[%s4951_s7 + $0x18] sm:$0xff] %vm307_vm0, %v2638_v49  ;;  %v2630_v17 = vadd.f32 %v2841_v60, %v2629_v58 }
 0x913   : > { %v3276_v16 = vpop.f32.mrf.mxu0 }
 0x914   : > { %2690 = vst.msk [vmem:[%s4951_s7 + $0x8] sm:$0xff] %vm307_vm0, %v2630_v17  ;;  %v2651_v42 = vadd.f32 %v3276_v16, %v2841_v60 }
 0x915   : > { %v2642_v59 = vpop.f32.mrf.mxu0 }
 0x916   : > { %2695 = vst.msk [vmem:[%s4951_s7 + $0x30] sm:$0xff] %vm307_vm0, %v2651_v42  ;;  %v2643_v61 = vadd.f32 %v2841_v60, %v2642_v59 }
 0x917   : > { %v3277_v8 = vpop.f32.mrf.mxu0 }
 0x918   : > { %2693 = vst.msk [vmem:[%s4951_s7 + $0x20] sm:$0xff] %vm307_vm0, %v2643_v61  ;;  %v2654_v53 = vadd.f32 %v3277_v8, %v2841_v60 }
 0x919   : > { %v2645_v33 = vpop.f32.mrf.mxu0 }
 0x91a   : > { %2696 = vst.msk [vmem:[%s4951_s7 + $0x38] sm:$0xff] %vm307_vm0, %v2654_v53  ;;  %v2646_v40 = vadd.f32 %v2841_v60, %v2645_v33 }
 0x91b   : > { %v3280_v44 = vpop.f32.mrf.mxu0 }
 0x91c   : > { %2694 = vst.msk [vmem:[%s4951_s7 + $0x28] sm:$0xff] %vm307_vm0, %v2646_v40  ;;  %v2667_v14 = vadd.f32 %v3280_v44, %v2841_v60 }
 0x91d   : > { %v2658_v37 = vpop.f32.mrf.mxu0 }
 0x91e   : > { %2699 = vst.msk [vmem:[%s4951_s7 + $0x50] sm:$0xff] %vm307_vm0, %v2667_v14  ;;  %v2659_v13 = vadd.f32 %v2841_v60, %v2658_v37 }
 0x91f   : > { %v3281_v31 = vpop.f32.mrf.mxu0 }
 0x920   : > { %2697 = vst.msk [vmem:[%s4951_s7 + $0x40] sm:$0xff] %vm307_vm0, %v2659_v13  ;;  %v2670_v4 = vadd.f32 %v3281_v31, %v2841_v60 }
 0x921   : > { %v2661_v5 = vpop.f32.mrf.mxu0 }
 0x922   : > { %2700 = vst.msk [vmem:[%s4951_s7 + $0x58] sm:$0xff] %vm307_vm0, %v2670_v4  ;;  %v2662_v48 = vadd.f32 %v2841_v60, %v2661_v5 }
 0x923   : > { %v3284_v50 = vpop.f32.mrf.mxu0 }
 0x924   : > { %2698 = vst.msk [vmem:[%s4951_s7 + $0x48] sm:$0xff] %vm307_vm0, %v2662_v48  ;;  %v2683_v36 = vadd.f32 %v3284_v50, %v2841_v60 }
 0x925   : > { %v2674_v28 = vpop.f32.mrf.mxu0 }
 0x926   : > { %2703 = vst.msk [vmem:[%s4951_s7 + $0x70] sm:$0xff] %vm307_vm0, %v2683_v36  ;;  %v2675_v63 = vadd.f32 %v2841_v60, %v2674_v28 }
 0x927   : > { %v3285_v10 = vpop.f32.mrf.mxu0 }
 0x928   : > { %2701 = vst.msk [vmem:[%s4951_s7 + $0x60] sm:$0xff] %vm307_vm0, %v2675_v63  ;;  %v2686_v45 = vadd.f32 %v3285_v10, %v2841_v60 }
 0x929   : > { %v2677_v34 = vpop.f32.mrf.mxu0 }
 0x92a   : > { %2704 = vst.msk [vmem:[%s4951_s7 + $0x78] sm:$0xff] %vm307_vm0, %v2686_v45  ;;  %v2678_v26 = vadd.f32 %v2841_v60, %v2677_v34 }
 0x92c   : > { %2702 = vst.msk [vmem:[%s4951_s7 + $0x68] sm:$0xff] %vm307_vm0, %v2678_v26 }
 0x92d PF: > { %s14_s15 = sadd.s32 1, %s3645_s15  }
 0x92e   : > { %p11_p4 = scmp.ge.s32.totalorder %s14_s15, 4  }
 0x930   :  { %13 = sbr.rel (!%p11_p4) target bundleno = 1 (0x1), region = 66 }

</bundles_post_ra>
